<compile_context>
chip_gen: v7x
topology: tpu7x:2x2x1
jax: 0.10.0
libtpu: 0.0.40
codegen_flags: <defaults>
</compile_context>

<pallas_src>
import jax
import jax.numpy as jnp
from jax.experimental import pallas as pl
from jax.experimental.pallas import tpu as pltpu

EPS = 1e-5  # nn.LayerNorm default

# PyTorch corner order x0..x7 is (h%2, w%2, t%2) =
#   (0,0,0),(1,0,0),(0,1,0),(0,0,1),(1,1,0),(0,1,1),(1,0,1),(1,1,1)
# The kernel uses lexicographic (p, q, r) order; _PERM[k_internal] = k_pytorch.
_PERM = (0, 3, 2, 5, 1, 6, 4, 7)


def _patch_merge_kernel(x_ref, g_ref, bias_ref, w_ref, o_ref):
    # x_ref   : (bh, 2, bw, 2, T2, 2C)  one spatial tile, both h/w parities
    # g_ref   : (4, 1, 2C)              permuted LayerNorm gamma (f32, resident)
    # bias_ref: (1, C4)                 precomputed beta @ W^T   (f32, resident)
    # w_ref   : (4, 2C, C4)             permuted reduction weight (bf16, resident)
    # o_ref   : (rows, C4)              rows = bh * bw * T2 merged tokens
    rows = o_ref.shape[0]
    c2 = x_ref.shape[-1]
    c8 = 4 * c2

    def corner(p, q):
        # (bh, bw, T2, 2C) parity slice, flattened to (rows, 2C) in f32.
        # Cast before the reshape so the f32 sublane rule (T2 % 8 == 0) makes
        # the flatten a free view even for bf16 inputs.
        v = x_ref[:, p, :, q, :, :].astype(jnp.float32)
        return v.reshape(rows, c2)

    # Pass 1: one-pass LayerNorm statistics (f32) over all 8C channels.
    # Corners are streamed from VMEM, not held live, to keep the per-row VMEM
    # footprint small (enables larger row tiles under the same limit).
    s1 = jnp.zeros((rows, 1), jnp.float32)
    s2 = jnp.zeros((rows, 1), jnp.float32)
    for p in range(2):
        for q in range(2):
            v = corner(p, q)
            s1 = s1 + v.sum(axis=-1, keepdims=True)
            s2 = s2 + (v * v).sum(axis=-1, keepdims=True)
    mean = s1 * (1.0 / c8)
    # One-pass E[x^2]-E[x]^2 in f32 (clamped); adequate for LN over activations.
    var = jnp.maximum(s2 * (1.0 / c8) - mean * mean, 0.0)
    inv = jax.lax.rsqrt(var + EPS)

    # Pass 2: re-read each corner pair, normalize, scale by gamma and matmul
    # (K = 2C each), accumulated in f32 on the MXU.  beta's contribution is
    # linear in the matmul, so it is the precomputed `bias` added once.
    acc = None
    for j, (p, q) in enumerate(((0, 0), (0, 1), (1, 0), (1, 1))):
        yn = (corner(p, q) - mean) * (inv * g_ref[j])             # (rows, 2C) f32
        contrib = jnp.dot(yn.astype(jnp.bfloat16), w_ref[j],
                          preferred_element_type=jnp.float32)      # (rows, C4) f32
        acc = contrib if acc is None else acc + contrib

    o_ref[...] = (acc + bias_ref[...]).astype(o_ref.dtype)


def _vmem_budget_bytes():
    """Generation-aware scoped-VMEM request.  v5e/v6e have 128 MiB physical
    VMEM, v7x only 64 MiB; cap the request at ~48 MiB (3/4 of the smallest)
    and leave headroom for compiler scratch."""
    cap = None
    try:
        info = pltpu.get_tpu_info()
        cap = getattr(info, "vmem_capacity_bytes", None)
    except Exception:
        cap = None
    if not cap:
        cap = 64 * 1024 * 1024   # conservative: assume v7x-sized VMEM
    return int(min(48 * 1024 * 1024, (cap * 3) // 4))


def _pick_tiles(H2, W2, T2, target_rows):
    """Pick (bh, bw): each grid step processes bh*bw*T2 merged tokens.
    Either bw == W2 (tile over H2) or bh == 1 (tile over W2) so the tile is a
    contiguous range of merged-token rows; the row count must be a multiple of
    8 (sublane) unless the tile covers a whole batch element.  The full tile
    (H2, W2) is always legal, so `legal` is never empty; if nothing fits under
    `target_rows`, the smallest legal tile is returned and the caller raises
    the requested VMEM limit to accommodate it."""
    full = H2 * W2 * T2
    cands = [(bh, W2) for bh in range(1, H2 + 1) if H2 % bh == 0]
    cands += [(1, bw) for bw in range(1, W2) if W2 % bw == 0]
    rows = lambda c: c[0] * c[1] * T2
    legal = [c for c in cands if rows(c) % 8 == 0 or rows(c) == full]
    under = [c for c in legal if rows(c) <= target_rows]
    if under:
        return max(under, key=rows)
    return min(legal, key=rows)


def patch_merging_forward(x, H, W, T, gamma, beta, weight, *,
                          target_rows=1024, out_dtype=None):
    """x: (B, H*W*T, C).  Returns (B, (H//2)*(W//2)*(T//2), C4) with
    C4 = weight.shape[0] (= 8 // reduce_factor * C).  Output dtype follows the
    input dtype (pass bf16 activations to halve HBM traffic) unless overridden."""
    B, L, C = x.shape
    assert L == H * W * T, "input feature has wrong size"
    assert H % 2 == 0 and W % 2 == 0 and T % 2 == 0, "x sizes must be even"
    H2, W2, T2 = H // 2, W // 2, T // 2
    C8, C4 = 8 * C, weight.shape[0]
    N = H2 * W2 * T2
    out_dtype = x.dtype if out_dtype is None else jnp.dtype(out_dtype)

    # Free reshape (contiguous): t-parity and channels share the minor dim.
    xr = x.reshape(B, H2, 2, W2, 2, T2, 2 * C)

    # Parameters: permute from PyTorch corner order to the kernel's (p,q,r)
    # order, pre-cast once, and fold beta into an output-space bias.
    perm = jnp.array(_PERM, dtype=jnp.int32)
    wT = jnp.transpose(weight).astype(jnp.float32)                # (8C, C4)
    w_k = (wT.reshape(8, C, C4)[perm]
             .reshape(4, 2 * C, C4).astype(jnp.bfloat16))          # (4, 2C, C4)
    g_k = (gamma.astype(jnp.float32).reshape(8, C)[perm]
             .reshape(4, 1, 2 * C))                                # (4, 1, 2C)
    bias = (beta.astype(jnp.float32) @ wT).reshape(1, C4)          # (1, C4)

    # --- Row tiling under an explicit, generation-aware VMEM budget. ---
    in_isize = jnp.dtype(x.dtype).itemsize
    out_isize = jnp.dtype(out_dtype).itemsize
    # Double-buffered input & output blocks + in-kernel f32 transients.
    bytes_per_row = (2 * C8 * in_isize + 2 * C4 * out_isize
                     + 48 * C + 12 * C4 + 64)
    param_bytes = 2 * (4 * 2 * C * 4 + C4 * 4 + 4 * 2 * C * C4 * 2) + (2 << 20)

    budget = _vmem_budget_bytes()
    rows_cap = max(8, int((budget - param_bytes) * 0.85) // bytes_per_row)
    steps_cap = max(8, (B * N) // 4)   # keep >= 4 grid steps (v7x: 2 TCs busy)
    bh, bw = _pick_tiles(H2, W2, T2, min(target_rows, rows_cap, steps_cap))
    rows = bh * bw * T2
    nwb = W2 // bw
    grid = (B, H2 // bh, nwb)

    needed = rows * bytes_per_row + param_bytes
    vmem_limit = int(budget if needed <= budget else min(needed, 100 << 20))

    out = pl.pallas_call(
        _patch_merge_kernel,
        out_shape=jax.ShapeDtypeStruct((B, N, C4), out_dtype),
        grid_spec=pltpu.PrefetchScalarGridSpec(
            num_scalar_prefetch=0,
            grid=grid,
            in_specs=[
                # One block spans both parity dims -> one DMA per step.
                pl.BlockSpec((None, bh, 2, bw, 2, T2, 2 * C),
                             lambda b, h, w: (b, h, 0, w, 0, 0, 0)),
                pl.BlockSpec((4, 1, 2 * C), lambda b, h, w: (0, 0, 0)),
                pl.BlockSpec((1, C4), lambda b, h, w: (0, 0)),
                pl.BlockSpec((4, 2 * C, C4), lambda b, h, w: (0, 0, 0)),
            ],
            out_specs=pl.BlockSpec((None, rows, C4),
                                   lambda b, h, w: (b, h * nwb + w, 0)),
        ),
        compiler_params=pltpu.CompilerParams(
            dimension_semantics=("parallel", "parallel", "parallel"),
            vmem_limit_bytes=vmem_limit),
    )(xr, g_k, bias, w_k)

    return out


def reference_forward(x, H, W, T, gamma, beta, weight):
    B, L, C = x.shape
    xv = x.reshape(B, H, W, T, C)
    x0 = xv[:, 0::2, 0::2, 0::2, :]
    x1 = xv[:, 1::2, 0::2, 0::2, :]
    x2 = xv[:, 0::2, 1::2, 0::2, :]
    x3 = xv[:, 0::2, 0::2, 1::2, :]
    x4 = xv[:, 1::2, 1::2, 0::2, :]
    x5 = xv[:, 0::2, 1::2, 1::2, :]
    x6 = xv[:, 1::2, 0::2, 1::2, :]
    x7 = xv[:, 1::2, 1::2, 1::2, :]
    y = jnp.concatenate([x0, x1, x2, x3, x4, x5, x6, x7], axis=-1)
    y = y.reshape(B, -1, 8 * C)
    mean = jnp.mean(y, axis=-1, keepdims=True)
    var = jnp.mean(jnp.square(y - mean), axis=-1, keepdims=True)
    yn = (y - mean) / jnp.sqrt(var + EPS)
    yn = yn * gamma + beta
    return yn @ weight.T


if __name__ == "__main__":
    # Small shapes consistent with the module forward (reduce_factor = 2).
    B, H, W, T, dim = 2, 8, 8, 16, 16
    L = H * W * T
    C8 = 8 * dim            # 128
    C4 = (8 // 2) * dim     # 64

    key = jax.random.PRNGKey(0)
    kx, kw, kg, kb = jax.random.split(key, 4)
    x = jax.random.normal(kx, (B, L, dim), dtype=jnp.float32)
    gamma = 1.0 + 0.1 * jax.random.normal(kg, (C8,), dtype=jnp.float32)
    beta = 0.05 * jax.random.normal(kb, (C8,), dtype=jnp.float32)
    weight = jax.random.normal(kw, (C4, C8), dtype=jnp.float32) * 0.02

    ref = reference_forward(x, H, W, T, gamma, beta, weight)

    # f32 path (matches PyTorch up to bf16 MXU operands with f32 accumulation).
    out = patch_merging_forward(x, H, W, T, gamma, beta, weight)
    out = jax.block_until_ready(out)
    assert out.shape == (B, (H // 2) * (W // 2) * (T // 2), C4)
    assert jnp.allclose(out, ref, atol=1e-2, rtol=1e-2), (
        float(jnp.max(jnp.abs(out - ref))))

    # bf16 activation path: halves the dominant HBM read and the write stream
    # (the kernel is HBM-bound on every TPU generation).
    x_bf = x.astype(jnp.bfloat16)
    out_bf = patch_merging_forward(x_bf, H, W, T, gamma, beta, weight)
    out_bf = jax.block_until_ready(out_bf)
    assert out_bf.dtype == jnp.bfloat16
    assert jnp.allclose(out_bf.astype(jnp.float32), ref, atol=5e-2, rtol=5e-2), (
        float(jnp.max(jnp.abs(out_bf.astype(jnp.float32) - ref))))

    print("KERNEL_OK")
</pallas_src>

<mosaic_0001>
module attributes {stable_mosaic.version = 11 : i64} {
  func.func @_patch_merge_kernel(%arg0: i32, %arg1: i32, %arg2: i32, %arg3: memref<1x2x2x4x2x8x32xf32, #tpu.memory_space<vmem>>, %arg4: memref<4x1x32xf32, #tpu.memory_space<vmem>>, %arg5: memref<1x64xf32, #tpu.memory_space<vmem>>, %arg6: memref<4x32x64xbf16, #tpu.memory_space<vmem>>, %arg7: memref<1x64x64xf32, #tpu.memory_space<vmem>>) attributes {dimension_semantics = [#tpu.dimension_semantics<parallel>, #tpu.dimension_semantics<parallel>, #tpu.dimension_semantics<parallel>], iteration_bounds = array<i64: 2, 2, 1>, scalar_prefetch = 0 : i64, scratch_operands = 0 : i64, tpu.core_type = #tpu.core_type<tc>, window_params = [{transform_indices = @transform_0, window_bounds = array<i64: 1, 2, 2, 4, 2, 8, 32>}, {pipeline_mode = #tpu.pipeline_mode<synchronous>, transform_indices = @transform_1, window_bounds = array<i64: 4, 1, 32>}, {pipeline_mode = #tpu.pipeline_mode<synchronous>, transform_indices = @transform_2, window_bounds = array<i64: 1, 64>}, {pipeline_mode = #tpu.pipeline_mode<synchronous>, transform_indices = @transform_3, window_bounds = array<i64: 4, 32, 64>}, {transform_indices = @transform_4, window_bounds = array<i64: 1, 64, 64>}]} {
    %cst = arith.constant 0.000000e+00 : f32
    %0 = vector.broadcast %cst : f32 to vector<64x1xf32>
    %cst_0 = arith.constant 0.000000e+00 : f32
    %1 = vector.broadcast %cst_0 : f32 to vector<64x1xf32>
    %c0 = arith.constant 0 : index
    %c0_1 = arith.constant 0 : index
    %c0_2 = arith.constant 0 : index
    %c0_3 = arith.constant 0 : index
    %c0_4 = arith.constant 0 : index
    %c0_5 = arith.constant 0 : index
    %c0_6 = arith.constant 0 : index
    %2 = vector.load %arg3[%c0, %c0_1, %c0_2, %c0_3, %c0_4, %c0_5, %c0_6] : memref<1x2x2x4x2x8x32xf32, #tpu.memory_space<vmem>>, vector<1x2x1x4x1x8x32xf32>
    %3 = vector.shape_cast %2 : vector<1x2x1x4x1x8x32xf32> to vector<2x4x8x32xf32>
    %4 = vector.shape_cast %3 : vector<2x4x8x32xf32> to vector<64x32xf32>
    %cst_7 = arith.constant dense<0.000000e+00> : vector<64xf32>
    %5 = vector.multi_reduction <add>, %4, %cst_7 [1] : vector<64x32xf32> to vector<64xf32>
    %6 = vector.shape_cast %5 : vector<64xf32> to vector<64x1xf32>
    %7 = arith.addf %0, %6 : vector<64x1xf32>
    %8 = arith.mulf %4, %4 : vector<64x32xf32>
    %cst_8 = arith.constant dense<0.000000e+00> : vector<64xf32>
    %9 = vector.multi_reduction <add>, %8, %cst_8 [1] : vector<64x32xf32> to vector<64xf32>
    %10 = vector.shape_cast %9 : vector<64xf32> to vector<64x1xf32>
    %11 = arith.addf %1, %10 : vector<64x1xf32>
    %c0_9 = arith.constant 0 : index
    %c0_10 = arith.constant 0 : index
    %c0_11 = arith.constant 0 : index
    %c0_12 = arith.constant 0 : index
    %c1 = arith.constant 1 : index
    %c0_13 = arith.constant 0 : index
    %c0_14 = arith.constant 0 : index
    %12 = vector.load %arg3[%c0_9, %c0_10, %c0_11, %c0_12, %c1, %c0_13, %c0_14] : memref<1x2x2x4x2x8x32xf32, #tpu.memory_space<vmem>>, vector<1x2x1x4x1x8x32xf32>
    %13 = vector.shape_cast %12 : vector<1x2x1x4x1x8x32xf32> to vector<2x4x8x32xf32>
    %14 = vector.shape_cast %13 : vector<2x4x8x32xf32> to vector<64x32xf32>
    %cst_15 = arith.constant dense<0.000000e+00> : vector<64xf32>
    %15 = vector.multi_reduction <add>, %14, %cst_15 [1] : vector<64x32xf32> to vector<64xf32>
    %16 = vector.shape_cast %15 : vector<64xf32> to vector<64x1xf32>
    %17 = arith.addf %7, %16 : vector<64x1xf32>
    %18 = arith.mulf %14, %14 : vector<64x32xf32>
    %cst_16 = arith.constant dense<0.000000e+00> : vector<64xf32>
    %19 = vector.multi_reduction <add>, %18, %cst_16 [1] : vector<64x32xf32> to vector<64xf32>
    %20 = vector.shape_cast %19 : vector<64xf32> to vector<64x1xf32>
    %21 = arith.addf %11, %20 : vector<64x1xf32>
    %c0_17 = arith.constant 0 : index
    %c0_18 = arith.constant 0 : index
    %c1_19 = arith.constant 1 : index
    %c0_20 = arith.constant 0 : index
    %c0_21 = arith.constant 0 : index
    %c0_22 = arith.constant 0 : index
    %c0_23 = arith.constant 0 : index
    %22 = vector.load %arg3[%c0_17, %c0_18, %c1_19, %c0_20, %c0_21, %c0_22, %c0_23] : memref<1x2x2x4x2x8x32xf32, #tpu.memory_space<vmem>>, vector<1x2x1x4x1x8x32xf32>
    %23 = vector.shape_cast %22 : vector<1x2x1x4x1x8x32xf32> to vector<2x4x8x32xf32>
    %24 = vector.shape_cast %23 : vector<2x4x8x32xf32> to vector<64x32xf32>
    %cst_24 = arith.constant dense<0.000000e+00> : vector<64xf32>
    %25 = vector.multi_reduction <add>, %24, %cst_24 [1] : vector<64x32xf32> to vector<64xf32>
    %26 = vector.shape_cast %25 : vector<64xf32> to vector<64x1xf32>
    %27 = arith.addf %17, %26 : vector<64x1xf32>
    %28 = arith.mulf %24, %24 : vector<64x32xf32>
    %cst_25 = arith.constant dense<0.000000e+00> : vector<64xf32>
    %29 = vector.multi_reduction <add>, %28, %cst_25 [1] : vector<64x32xf32> to vector<64xf32>
    %30 = vector.shape_cast %29 : vector<64xf32> to vector<64x1xf32>
    %31 = arith.addf %21, %30 : vector<64x1xf32>
    %c0_26 = arith.constant 0 : index
    %c0_27 = arith.constant 0 : index
    %c1_28 = arith.constant 1 : index
    %c0_29 = arith.constant 0 : index
    %c1_30 = arith.constant 1 : index
    %c0_31 = arith.constant 0 : index
    %c0_32 = arith.constant 0 : index
    %32 = vector.load %arg3[%c0_26, %c0_27, %c1_28, %c0_29, %c1_30, %c0_31, %c0_32] : memref<1x2x2x4x2x8x32xf32, #tpu.memory_space<vmem>>, vector<1x2x1x4x1x8x32xf32>
    %33 = vector.shape_cast %32 : vector<1x2x1x4x1x8x32xf32> to vector<2x4x8x32xf32>
    %34 = vector.shape_cast %33 : vector<2x4x8x32xf32> to vector<64x32xf32>
    %cst_33 = arith.constant dense<0.000000e+00> : vector<64xf32>
    %35 = vector.multi_reduction <add>, %34, %cst_33 [1] : vector<64x32xf32> to vector<64xf32>
    %36 = vector.shape_cast %35 : vector<64xf32> to vector<64x1xf32>
    %37 = arith.addf %27, %36 : vector<64x1xf32>
    %38 = arith.mulf %34, %34 : vector<64x32xf32>
    %cst_34 = arith.constant dense<0.000000e+00> : vector<64xf32>
    %39 = vector.multi_reduction <add>, %38, %cst_34 [1] : vector<64x32xf32> to vector<64xf32>
    %40 = vector.shape_cast %39 : vector<64xf32> to vector<64x1xf32>
    %41 = arith.addf %31, %40 : vector<64x1xf32>
    %cst_35 = arith.constant 7.812500e-03 : f32
    %42 = vector.broadcast %cst_35 : f32 to vector<64x1xf32>
    %43 = arith.mulf %37, %42 : vector<64x1xf32>
    %cst_36 = arith.constant 7.812500e-03 : f32
    %44 = vector.broadcast %cst_36 : f32 to vector<64x1xf32>
    %45 = arith.mulf %41, %44 : vector<64x1xf32>
    %46 = arith.mulf %43, %43 : vector<64x1xf32>
    %47 = arith.subf %45, %46 : vector<64x1xf32>
    %cst_37 = arith.constant 0.000000e+00 : f32
    %48 = vector.broadcast %cst_37 : f32 to vector<64x1xf32>
    %49 = arith.maximumf %47, %48 : vector<64x1xf32>
    %cst_38 = arith.constant 9.99999974E-6 : f32
    %50 = vector.broadcast %cst_38 : f32 to vector<64x1xf32>
    %51 = arith.addf %49, %50 : vector<64x1xf32>
    %52 = math.rsqrt %51 : vector<64x1xf32>
    %c0_39 = arith.constant 0 : index
    %c0_40 = arith.constant 0 : index
    %c0_41 = arith.constant 0 : index
    %c0_42 = arith.constant 0 : index
    %c0_43 = arith.constant 0 : index
    %c0_44 = arith.constant 0 : index
    %c0_45 = arith.constant 0 : index
    %53 = vector.load %arg3[%c0_39, %c0_40, %c0_41, %c0_42, %c0_43, %c0_44, %c0_45] : memref<1x2x2x4x2x8x32xf32, #tpu.memory_space<vmem>>, vector<1x2x1x4x1x8x32xf32>
    %54 = vector.shape_cast %53 : vector<1x2x1x4x1x8x32xf32> to vector<2x4x8x32xf32>
    %55 = vector.shape_cast %54 : vector<2x4x8x32xf32> to vector<64x32xf32>
    %56 = vector.broadcast %43 : vector<64x1xf32> to vector<64x32xf32>
    %57 = arith.subf %55, %56 : vector<64x32xf32>
    %c0_46 = arith.constant 0 : index
    %c0_47 = arith.constant 0 : index
    %c0_48 = arith.constant 0 : index
    %58 = vector.load %arg4[%c0_46, %c0_47, %c0_48] : memref<4x1x32xf32, #tpu.memory_space<vmem>>, vector<1x1x32xf32>
    %59 = vector.shape_cast %58 : vector<1x1x32xf32> to vector<1x32xf32>
    %60 = vector.broadcast %52 : vector<64x1xf32> to vector<64x32xf32>
    %61 = vector.broadcast %59 : vector<1x32xf32> to vector<64x32xf32>
    %62 = arith.mulf %60, %61 : vector<64x32xf32>
    %63 = arith.mulf %57, %62 : vector<64x32xf32>
    %64 = arith.truncf %63 : vector<64x32xf32> to vector<64x32xbf16>
    %c0_49 = arith.constant 0 : index
    %c0_50 = arith.constant 0 : index
    %c0_51 = arith.constant 0 : index
    %65 = vector.load %arg6[%c0_49, %c0_50, %c0_51] : memref<4x32x64xbf16, #tpu.memory_space<vmem>>, vector<1x32x64xbf16>
    %66 = vector.shape_cast %65 : vector<1x32x64xbf16> to vector<32x64xbf16>
    %cst_52 = arith.constant dense<0.000000e+00> : vector<64x64xf32>
    %67 = tpu.matmul %64, %66, %cst_52 {dimension_numbers = #tpu.dot_dimension_numbers<[1], [0], [0], [1], [0, 0, 1, 1], [], []>} : vector<64x32xbf16>, vector<32x64xbf16>, vector<64x64xf32> -> vector<64x64xf32>
    %c0_53 = arith.constant 0 : index
    %c0_54 = arith.constant 0 : index
    %c0_55 = arith.constant 0 : index
    %c0_56 = arith.constant 0 : index
    %c1_57 = arith.constant 1 : index
    %c0_58 = arith.constant 0 : index
    %c0_59 = arith.constant 0 : index
    %68 = vector.load %arg3[%c0_53, %c0_54, %c0_55, %c0_56, %c1_57, %c0_58, %c0_59] : memref<1x2x2x4x2x8x32xf32, #tpu.memory_space<vmem>>, vector<1x2x1x4x1x8x32xf32>
    %69 = vector.shape_cast %68 : vector<1x2x1x4x1x8x32xf32> to vector<2x4x8x32xf32>
    %70 = vector.shape_cast %69 : vector<2x4x8x32xf32> to vector<64x32xf32>
    %71 = vector.broadcast %43 : vector<64x1xf32> to vector<64x32xf32>
    %72 = arith.subf %70, %71 : vector<64x32xf32>
    %c1_60 = arith.constant 1 : index
    %c0_61 = arith.constant 0 : index
    %c0_62 = arith.constant 0 : index
    %73 = vector.load %arg4[%c1_60, %c0_61, %c0_62] : memref<4x1x32xf32, #tpu.memory_space<vmem>>, vector<1x1x32xf32>
    %74 = vector.shape_cast %73 : vector<1x1x32xf32> to vector<1x32xf32>
    %75 = vector.broadcast %52 : vector<64x1xf32> to vector<64x32xf32>
    %76 = vector.broadcast %74 : vector<1x32xf32> to vector<64x32xf32>
    %77 = arith.mulf %75, %76 : vector<64x32xf32>
    %78 = arith.mulf %72, %77 : vector<64x32xf32>
    %79 = arith.truncf %78 : vector<64x32xf32> to vector<64x32xbf16>
    %c1_63 = arith.constant 1 : index
    %c0_64 = arith.constant 0 : index
    %c0_65 = arith.constant 0 : index
    %80 = vector.load %arg6[%c1_63, %c0_64, %c0_65] : memref<4x32x64xbf16, #tpu.memory_space<vmem>>, vector<1x32x64xbf16>
    %81 = vector.shape_cast %80 : vector<1x32x64xbf16> to vector<32x64xbf16>
    %cst_66 = arith.constant dense<0.000000e+00> : vector<64x64xf32>
    %82 = tpu.matmul %79, %81, %cst_66 {dimension_numbers = #tpu.dot_dimension_numbers<[1], [0], [0], [1], [0, 0, 1, 1], [], []>} : vector<64x32xbf16>, vector<32x64xbf16>, vector<64x64xf32> -> vector<64x64xf32>
    %83 = arith.addf %67, %82 : vector<64x64xf32>
    %c0_67 = arith.constant 0 : index
    %c0_68 = arith.constant 0 : index
    %c1_69 = arith.constant 1 : index
    %c0_70 = arith.constant 0 : index
    %c0_71 = arith.constant 0 : index
    %c0_72 = arith.constant 0 : index
    %c0_73 = arith.constant 0 : index
    %84 = vector.load %arg3[%c0_67, %c0_68, %c1_69, %c0_70, %c0_71, %c0_72, %c0_73] : memref<1x2x2x4x2x8x32xf32, #tpu.memory_space<vmem>>, vector<1x2x1x4x1x8x32xf32>
    %85 = vector.shape_cast %84 : vector<1x2x1x4x1x8x32xf32> to vector<2x4x8x32xf32>
    %86 = vector.shape_cast %85 : vector<2x4x8x32xf32> to vector<64x32xf32>
    %87 = vector.broadcast %43 : vector<64x1xf32> to vector<64x32xf32>
    %88 = arith.subf %86, %87 : vector<64x32xf32>
    %c2 = arith.constant 2 : index
    %c0_74 = arith.constant 0 : index
    %c0_75 = arith.constant 0 : index
    %89 = vector.load %arg4[%c2, %c0_74, %c0_75] : memref<4x1x32xf32, #tpu.memory_space<vmem>>, vector<1x1x32xf32>
    %90 = vector.shape_cast %89 : vector<1x1x32xf32> to vector<1x32xf32>
    %91 = vector.broadcast %52 : vector<64x1xf32> to vector<64x32xf32>
    %92 = vector.broadcast %90 : vector<1x32xf32> to vector<64x32xf32>
    %93 = arith.mulf %91, %92 : vector<64x32xf32>
    %94 = arith.mulf %88, %93 : vector<64x32xf32>
    %95 = arith.truncf %94 : vector<64x32xf32> to vector<64x32xbf16>
    %c2_76 = arith.constant 2 : index
    %c0_77 = arith.constant 0 : index
    %c0_78 = arith.constant 0 : index
    %96 = vector.load %arg6[%c2_76, %c0_77, %c0_78] : memref<4x32x64xbf16, #tpu.memory_space<vmem>>, vector<1x32x64xbf16>
    %97 = vector.shape_cast %96 : vector<1x32x64xbf16> to vector<32x64xbf16>
    %cst_79 = arith.constant dense<0.000000e+00> : vector<64x64xf32>
    %98 = tpu.matmul %95, %97, %cst_79 {dimension_numbers = #tpu.dot_dimension_numbers<[1], [0], [0], [1], [0, 0, 1, 1], [], []>} : vector<64x32xbf16>, vector<32x64xbf16>, vector<64x64xf32> -> vector<64x64xf32>
    %99 = arith.addf %83, %98 : vector<64x64xf32>
    %c0_80 = arith.constant 0 : index
    %c0_81 = arith.constant 0 : index
    %c1_82 = arith.constant 1 : index
    %c0_83 = arith.constant 0 : index
    %c1_84 = arith.constant 1 : index
    %c0_85 = arith.constant 0 : index
    %c0_86 = arith.constant 0 : index
    %100 = vector.load %arg3[%c0_80, %c0_81, %c1_82, %c0_83, %c1_84, %c0_85, %c0_86] : memref<1x2x2x4x2x8x32xf32, #tpu.memory_space<vmem>>, vector<1x2x1x4x1x8x32xf32>
    %101 = vector.shape_cast %100 : vector<1x2x1x4x1x8x32xf32> to vector<2x4x8x32xf32>
    %102 = vector.shape_cast %101 : vector<2x4x8x32xf32> to vector<64x32xf32>
    %103 = vector.broadcast %43 : vector<64x1xf32> to vector<64x32xf32>
    %104 = arith.subf %102, %103 : vector<64x32xf32>
    %c3 = arith.constant 3 : index
    %c0_87 = arith.constant 0 : index
    %c0_88 = arith.constant 0 : index
    %105 = vector.load %arg4[%c3, %c0_87, %c0_88] : memref<4x1x32xf32, #tpu.memory_space<vmem>>, vector<1x1x32xf32>
    %106 = vector.shape_cast %105 : vector<1x1x32xf32> to vector<1x32xf32>
    %107 = vector.broadcast %52 : vector<64x1xf32> to vector<64x32xf32>
    %108 = vector.broadcast %106 : vector<1x32xf32> to vector<64x32xf32>
    %109 = arith.mulf %107, %108 : vector<64x32xf32>
    %110 = arith.mulf %104, %109 : vector<64x32xf32>
    %111 = arith.truncf %110 : vector<64x32xf32> to vector<64x32xbf16>
    %c3_89 = arith.constant 3 : index
    %c0_90 = arith.constant 0 : index
    %c0_91 = arith.constant 0 : index
    %112 = vector.load %arg6[%c3_89, %c0_90, %c0_91] : memref<4x32x64xbf16, #tpu.memory_space<vmem>>, vector<1x32x64xbf16>
    %113 = vector.shape_cast %112 : vector<1x32x64xbf16> to vector<32x64xbf16>
    %cst_92 = arith.constant dense<0.000000e+00> : vector<64x64xf32>
    %114 = tpu.matmul %111, %113, %cst_92 {dimension_numbers = #tpu.dot_dimension_numbers<[1], [0], [0], [1], [0, 0, 1, 1], [], []>} : vector<64x32xbf16>, vector<32x64xbf16>, vector<64x64xf32> -> vector<64x64xf32>
    %115 = arith.addf %99, %114 : vector<64x64xf32>
    %c0_93 = arith.constant 0 : index
    %c0_94 = arith.constant 0 : index
    %116 = vector.load %arg5[%c0_93, %c0_94] : memref<1x64xf32, #tpu.memory_space<vmem>>, vector<1x64xf32>
    %117 = vector.broadcast %116 : vector<1x64xf32> to vector<64x64xf32>
    %118 = arith.addf %115, %117 : vector<64x64xf32>
    %c0_95 = arith.constant 0 : index
    %c0_96 = arith.constant 0 : index
    %c0_97 = arith.constant 0 : index
    %119 = vector.load %arg7[%c0_95, %c0_96, %c0_97] : memref<1x64x64xf32, #tpu.memory_space<vmem>>, vector<1x64x64xf32>
    %120 = vector.shape_cast %119 : vector<1x64x64xf32> to vector<64x64xf32>
    %121 = vector.shape_cast %118 : vector<64x64xf32> to vector<1x64x64xf32>
    tpu.vector_store %arg7[%c0_95, %c0_96, %c0_97], %121 {strides = array<i32>} : memref<1x64x64xf32, #tpu.memory_space<vmem>>, vector<1x64x64xf32>,
    return
  }
  func.func @transform_0(%arg0: i32, %arg1: i32, %arg2: i32) -> (i32, i32, i32, i32, i32, i32, i32) {
    %c0_i32 = arith.constant 0 : i32
    %c0_i32_0 = arith.constant 0 : i32
    %c0_i32_1 = arith.constant 0 : i32
    %c0_i32_2 = arith.constant 0 : i32
    %c0_i32_3 = arith.constant 0 : i32
    return %arg0, %arg1, %c0_i32, %arg2, %c0_i32_0, %c0_i32_1, %c0_i32_2 : i32, i32, i32, i32, i32, i32, i32
  }
  func.func @transform_1(%arg0: i32, %arg1: i32, %arg2: i32) -> (i32, i32, i32) {
    %c0_i32 = arith.constant 0 : i32
    %c0_i32_0 = arith.constant 0 : i32
    %c0_i32_1 = arith.constant 0 : i32
    %c0_i32_2 = arith.constant 0 : i32
    return %c0_i32, %c0_i32_0, %c0_i32_1 : i32, i32, i32
  }
  func.func @transform_2(%arg0: i32, %arg1: i32, %arg2: i32) -> (i32, i32) {
    %c0_i32 = arith.constant 0 : i32
    %c0_i32_0 = arith.constant 0 : i32
    %c0_i32_1 = arith.constant 0 : i32
    return %c0_i32, %c0_i32_0 : i32, i32
  }
  func.func @transform_3(%arg0: i32, %arg1: i32, %arg2: i32) -> (i32, i32, i32) {
    %c0_i32 = arith.constant 0 : i32
    %c0_i32_0 = arith.constant 0 : i32
    %c0_i32_1 = arith.constant 0 : i32
    %c0_i32_2 = arith.constant 0 : i32
    return %c0_i32, %c0_i32_0, %c0_i32_1 : i32, i32, i32
  }
  func.func @transform_4(%arg0: i32, %arg1: i32, %arg2: i32) -> (i32, i32, i32) {
    %c1_i32 = arith.constant 1 : i32
    %0 = arith.muli %arg1, %c1_i32 : i32
    %1 = arith.addi %0, %arg2 : i32
    %c0_i32 = arith.constant 0 : i32
    %c0_i32_0 = arith.constant 0 : i32
    return %arg0, %1, %c0_i32 : i32, i32, i32
  }
}

</mosaic_0001>

<bundles_post_ra>
// kernel: tpu_custom_call.1
= control target key start
LH: loop header
LB: loop body
LE: loop exit
PB: predicated region body
PF: predicated region fallthrough
CT: control target
= control target key end

     0   :  { %s2573_s0 = inlined_call_operand.hbm [shape: f32[2,4,2,4,2,8,32], index: 0, kind: input, shape index: {}]   ;;  %s2574_s1 = inlined_call_operand.hbm [shape: f32[4,1,32], index: 1, kind: input, shape index: {}]   ;;  %s2575_s2 = inlined_call_operand.vmem [shape: f32[1,64], index: 2, kind: input, shape index: {}]   ;;  %s2576_s3 = inlined_call_operand.hbm [shape: bf16[4,32,64], index: 3, kind: input, shape index: {}]   ;;  %s2577_s4 = inlined_call_operand.vmem [shape: f32[2,128,64], index: 4, kind: output, shape index: {}]  }
   0x1   :  { %2597 = sst [smem:[#allocation24_spill]] %s2574_s1 }
   0x2   :  { %2598 = sst [smem:[#allocation25_spill]] %s2576_s3 }
   0x3   :  { %9 = vsyncpa [#allocation3], 0 }
   0x4   :  { %11 = vsyncpa [#allocation3 + $0x1], 0 }
   0x5   :  { %12 = vsyncpa [#allocation5], 0  ;;  %s1842_s15 = smov 0   ;;  %s1844_s16 = smov 0  }
   0x6   :  { %s1846_s17 = smov 0   ;;  %s1848_s18 = smov 0  }
   0x7   :  { %s1850_s19 = smov 0   ;;  %s1852_s20 = smov 0  }
   0x8   :  { %s1854_s21 = smov 0   ;;  %s1856_s22 = smov 0  }
   0x9 LB: > { %s1358_s23 = sadd.s32 4294967295, %s1806_s22   ;;  %p61_p0 = scmp.ne.s32.totalorder %s1782_s16, %s1778_s15  ;;  %s1806_s22 = sphi %s1856_s22, %s18_s22   ;;  %s1802_s21 = sphi %s1854_s21, %s2647_s21   ;;  %s1798_s20 = sphi %s1852_s20, %s2646_s20   ;;  %s1794_s19 = sphi %s1850_s19, %s2645_s19   ;;  %s1790_s18 = sphi %s1848_s18, %s2644_s18   ;;  %s1786_s17 = sphi %s1846_s17, %s2643_s17   ;;  %s1782_s16 = sphi %s1844_s16, %s2642_s16   ;;  %s1778_s15 = sphi %s1842_s15, %s2641_s15  }
   0xa   : > { %p1882_p1 = scmp.eq.s32.totalorder %s1358_s23, 0  ;;  %p1360_p2 = scmp.ge.s32.totalorder %s1806_s22, 1 }
   0xb   : > { %p165_p3 = scmp.lt.s32.totalorder %s1806_s22, 5  ;;  %s1808_s27 = smov [#allocation4]  }
   0xc   : > { %s2599_s24 = scalar_select %p1882_p1, 1, 0 }
   0xd   : > { %p1890_p4 = por %p1882_p1, %p61_p0  ;;  %p1894_p5 = pnand %p1360_p2, %p165_p3 }
   0xe   : > { %s177_s28 = sshll.u32 %s1808_s27, 4  ;;  %s1809_s30 = smov [#allocation6]   ;;  %s178_s28 = int_to_ptr.vmem [resolvable:$true] %s177_s28 }
   0xf   : > { %s2600_s25 = scalar_select %p1890_p4, 1, 0 }
  0x10   : > { %s2601_s26 = scalar_select %p1894_p5, 1, 0 }
  0x11   : > { %p1538_p6 = pneg %p1894_p5  ;;  %s193_s5 = sshll.u32 %s1809_s30, 4  ;;  %s1906_s5 = int_to_ptr.vmem [resolvable:$true] %s193_s5 }
  0x12   : > { %s2603_s1 = sld [smem:[#allocation24_spill]] }
  0x13   : > { %p1902_p7 = pnand %p1538_p6, %p1882_p1 }
  0x15   : > { %p1652_p9 = pneg %p1902_p7 }
  0x18   : > { %s1650_s8 = scalar_lea.hbm %s2603_s1, 64 }
  0x19   : > { %p1651_p8 = scmp.ne.s32.totalorder %s2603_s1, %s1650_s8  ;;  %p1657_p12 = scmp.lt.u32.totalorder %s1650_s8, %s2603_s1 }
  0x1b   : > { %p1653_p10 = pnand %p1652_p9, %p1651_p8 }
  0x1d   : > { %p1654_p11 = pneg %p1653_p10 }
  0x1f   : > { %p1659_p13 = pnand %p1657_p12, %p1654_p11 }
  0x21   : > { %1662 = shalt.err (!%p1659_p13)
}
  0x22   : > { %s1663_s13 = scalar_lea.vmem %s178_s28, 64  ;;  %p1671_p6 = scmp.lt.s32.totalorder %s178_s28, %s178_s28 }
  0x23   : > { %p1664_p0 = scmp.ne.s32.totalorder %s178_s28, %s1663_s13  ;;  %p1672_p1 = scmp.lt.s32.totalorder %s1663_s13, %s1663_s13 }
  0x25   : > { %p1666_p2 = pnand %p1664_p0, %p1652_p9  ;;  %p1673_p4 = por %p1672_p1, %p1671_p6 }
  0x27   : > { %p1667_p3 = pneg %p1666_p2 }
  0x29   : > { %p1674_p5 = pnand %p1673_p4, %p1667_p3 }
  0x2b   : > { %1677 = shalt.err (!%p1674_p5)
}
  0x2c   : > { %s1810_s14 = smov 16   ;;  %s1811_s15 = smov 1  }
  0x2d   : > { %1541 = dma.hbm_to_vmem [thread:$0]  (!%p1902_p7), %s2603_s1, 64, %s178_s28, [#allocation5], %s1810_s14, %s1810_s14, %s1811_s15  }
  0x2e   : > { %s2604_s3 = sld [smem:[#allocation25_spill]] }
  0x34   : > { %s1678_s7 = scalar_lea.hbm %s2604_s3, 1024 }
  0x35   : > { %p1679_p8 = scmp.ne.s32.totalorder %s2604_s3, %s1678_s7  ;;  %p1685_p5 = scmp.lt.u32.totalorder %s1678_s7, %s2604_s3 }
  0x37   : > { %p1681_p1 = pnand %p1679_p8, %p1652_p9 }
  0x39   : > { %p1682_p4 = pneg %p1681_p1 }
  0x3b   : > { %p1687_p10 = pnand %p1685_p5, %p1682_p4 }
  0x3d   : > { %1690 = shalt.err (!%p1687_p10)
}
  0x3e   : > { %s1691_s28 = scalar_lea.vmem %s1906_s5, 1024  ;;  %p1699_p0 = scmp.lt.s32.totalorder %s1906_s5, %s1906_s5 }
  0x3f   : > { %p1692_p11 = scmp.ne.s32.totalorder %s1906_s5, %s1691_s28  ;;  %p1700_p2 = scmp.lt.s32.totalorder %s1691_s28, %s1691_s28 }
  0x41   : > { %p1694_p12 = pnand %p1692_p11, %p1652_p9  ;;  %p1701_p3 = por %p1700_p2, %p1699_p0 }
  0x43   : > { %p1695_p13 = pneg %p1694_p12 }
  0x45   : > { %p1702_p6 = pnand %p1701_p3, %p1695_p13 }
  0x47   : > { %1705 = shalt.err (!%p1702_p6)
}
  0x48   : > { %s1812_s12 = smov 64   ;;  %s1813_s13 = smov 4  }
  0x49   : > { %1544 = dma.hbm_to_vmem [thread:$0]  (!%p1902_p7), %s2604_s3, 1024, %s1906_s5, [#allocation5], %s1812_s12, %s1812_s12, %s1813_s13  }
  0x4a   : > { %s33_s23 = sadd.s32 1, %s1798_s20  ;;  %s37_s27 = sadd.s32 1, %s1802_s21 }
  0x4b   : > { %p35_p9 = scmp.ge.s32.totalorder %s33_s23, 2  ;;  %s48_s30 = sadd.s32 1, %s1786_s17 }
  0x4c   : > { %p55_p8 = scmp.ne.s32.totalorder %s1786_s17, %s1782_s16  ;;  %p56_p1 = scmp.eq.s32.totalorder %s1806_s22, 0 }
  0x4d   : > { %s2649_s23 = smov (%p35_p9, %s33_s23), 0  ;;  %s2651_s27 = smov (!%p35_p9, %s37_s27), %s1802_s21 }
  0x4e   : > { %2605 = sst [smem:[#allocation9_spill]] %s2649_s23  ;;  %s42_s6 = ssub.s32 %s1798_s20, %s2649_s23 }
  0x4f   : > { %p1966_p4 = por %p56_p1, %p55_p8  ;;  %p39_p5 = scmp.ge.s32.totalorder %s2651_s27, 2 }
  0x50   : > { %p1551_p7 = scmp.lt.s32.totalorder %s1806_s22, 4  ;;  %s207_s5 = sand.u32 1, %s1786_s17  }
  0x51   : > { %s1431_s7 = sshll.u32 %s1798_s20, 5  ;;  %s2653_s27 = smov (%p39_p5, %s2651_s27), 0 }
  0x52   : > { %s1364_s8 = sshll.u32 %s207_s5, 8  ;;  %s41_s9 = ssub.s32 %s1802_s21, %s2653_s27 }
  0x53   : > { %s43_s10 = sor.u32 %s42_s6, %s41_s9  ;;  %s1367_s11 = sshll.u32 %s1802_s21, 6 }
  0x54   : > { %p46_p10 = scmp.eq.s32.totalorder %s43_s10, 0  ;;  %s221_s28 = sadd.s32 %s1431_s7, %s1367_s11 }
  0x55   : > { %s1368_s12 = sshll.u32 %s221_s28, 7  ;;  %s211_s13 = scalar_lea.vmem [#allocation2], %s1364_s8 }
  0x56   : > { %s224_s14 = sshll.u32 %s211_s13, 4  ;;  %s1984_s23 = scalar_lea.hbm %s2573_s0, %s1368_s12  ;;  %s1986_s14 = int_to_ptr.vmem [resolvable:$true] %s224_s14 }
  0x57   : > { %s1979_s15 = scalar_select %p46_p10, %s1786_s17, %s48_s30  }
  0x58   : > { %p1992_p11 = pnand %p1551_p7, %p1966_p4  ;;  %s1996_s30 = scalar_lea.sflag [#allocation3], %s207_s5 }
  0x59   : > { %s1706_s7 = scalar_lea.hbm %s1984_s23, 4096  ;;  %s1711_s29 = scalar_lea.hbm %s2573_s0, 16384 }
  0x5a   : > { %p1707_p12 = scmp.ne.s32.totalorder %s1984_s23, %s1706_s7  ;;  %p1708_p13 = pneg %p1992_p11 }
  0x5b   : > { %p1712_p3 = scmp.lt.u32.totalorder %s1984_s23, %s2573_s0  ;;  %p1713_p6 = scmp.lt.u32.totalorder %s1711_s29, %s1706_s7 }
  0x5c   : > { %p1709_p0 = pnand %p1708_p13, %p1707_p12  ;;  %p1715_p8 = scmp.lt.u32.totalorder %s1706_s7, %s1984_s23 }
  0x5d   : > { %p1714_p9 = por %p1713_p6, %p1712_p3 }
  0x5e   : > { %p1710_p2 = pneg %p1709_p0 }
  0x5f   : > { %p1716_p1 = por %p1715_p8, %p1714_p9 }
  0x61   : > { %p1717_p4 = pnand %p1716_p1, %p1710_p2 }
  0x63   : > { %1720 = shalt.err (!%p1717_p4)
}
  0x64   : > { %s1721_s5 = scalar_lea.vmem %s1986_s14, 4096  ;;  %s1814_s10 = smov [#allocation2]  }
  0x65   : > { %p1722_p5 = scmp.ne.s32.totalorder %s1986_s14, %s1721_s5  ;;  %s1726_s11 = sshll.u32 %s1814_s10, 4  ;;  %s1727_s11 = int_to_ptr.vmem [resolvable:$false] %s1726_s11 }
  0x66   : > { %s1728_s28 = scalar_lea.vmem %s1727_s11, 8192  ;;  %p1729_p12 = scmp.lt.s32.totalorder %s1986_s14, %s1727_s11 }
  0x67   : > { %p1724_p7 = pnand %p1722_p5, %p1708_p13  ;;  %p1730_p0 = scmp.lt.s32.totalorder %s1728_s28, %s1721_s5 }
  0x69   : > { %p1725_p10 = pneg %p1724_p7  ;;  %p1731_p3 = por %p1730_p0, %p1729_p12 }
  0x6b   : > { %p1732_p6 = pnand %p1731_p3, %p1725_p10 }
  0x6d   : > { %1735 = shalt.err (!%p1732_p6)
}
  0x6e   : > { %s1815_s12 = smov 128   ;;  %s1816_s13 = smov 8  }
  0x6f   : > { %1548 = dma.hbm_to_vmem [thread:$0]  (!%p1992_p11), %s1984_s23, 4096, %s1986_s14, %s1996_s30, %s1815_s12, %s1815_s12, %s1816_s13  }
  0x70   : > { %p2608_p13 = scmp.ne.s32.totalorder %s2601_s26, 0 }
  0x72   : > { %236 = sbr.rel (%p2608_p13) target bundleno = 660 (0x294), region = 36 }
  0x79   : > { %s238_s7 = sand.u32 1, %s1782_s16   ;;  %p2609_p2 = scmp.ne.s32.totalorder %s2600_s25, 0 }
  0x7a   : > { %s1370_s1 = sshll.u32 %s238_s7, 8  ;;  %s239_s3 = scalar_lea.sflag [#allocation3], %s238_s7 }
  0x7b   : > { %s2027_s29 = scalar_lea.vmem [#allocation2], %s1370_s1 }
  0x7c   : > { %1769 = dma.done.wait (%p2609_p2), %s239_s3, 4096  }
  0x7d   : > { %1771 = vsyncadd (%p2609_p2), %s239_s3, 4294963200  ;;  %p2610_p9 = scmp.ne.s32.totalorder %s2599_s24, 0 }
  0x7f   : > { %1773 = dma.done.wait (%p2610_p9), [#allocation5], 1088  }
  0x80   : > { %1775 = vsyncadd (%p2610_p9), [#allocation5], 4294966208  ;;  %vm303_vm0 = vcmask 261120   ;;  %v2038_v0 = vld [vmem:[%s2027_s29 + $0x8] sm:$0xff]  ;;  %v2041_v1 = vld [vmem:[%s2027_s29] sm:$0xff]  ;;  %s1373_s24 = sshll.u32 %s1790_s18, 3 }
  0x81   : > { %v2044_v2 = vld [vmem:[%s2027_s29 + $0x18] sm:$0xff]  ;;  %v385_v3 = vsel %vm303_vm0, %v2038_v0, 0.0  ;;  %v304_v4 = vsel %vm303_vm0, %v2041_v1, 0.0  ;;  %v2051_v5 = vld [vmem:[%s2027_s29 + $0x10] sm:$0xff]  ;;  %v2061_v9 = vld [vmem:[%s2027_s29 + $0x20] sm:$0xff]  ;;  %v336_v15 = vmul.f32 %v2041_v1, %v2041_v1  ;;  %v417_v21 = vmul.f32 %v2038_v0, %v2038_v0  ;;  %p284_p11 = scmp.lt.s32.totalorder %s1794_s19, 1 }
  0x82   : > { %386 = vadd.xlane.f32.xlu1 %v385_v3  ;;  %305 = vadd.xlane.f32.xlu0 %v304_v4  ;;  %v388_v6 = vsel %vm303_vm0, %v2044_v2, 0.0  ;;  %v307_v7 = vsel %vm303_vm0, %v2051_v5, 0.0  ;;  %v2058_v8 = vld [vmem:[%s2027_s29 + $0x30] sm:$0xff]  ;;  %v310_v11 = vsel %vm303_vm0, %v2061_v9, 0.0  ;;  %v2068_v12 = vld [vmem:[%s2027_s29 + $0x38] sm:$0xff]  ;;  %v2071_v13 = vld [vmem:[%s2027_s29 + $0x28] sm:$0xff]  ;;  %v337_v14 = vmul.f32 %v2051_v5, %v2051_v5 }
  0x83   : > { %v313_v10 = vsel %vm303_vm0, %v2058_v8, 0.0  ;;  %v394_v16 = vsel %vm303_vm0, %v2068_v12, 0.0  ;;  %v391_v17 = vsel %vm303_vm0, %v2071_v13, 0.0  ;;  %v344_v19 = vsel %vm303_vm0, %v336_v15, 0.0  ;;  %v2090_v24 = vld [vmem:[%s2027_s29 + $0x50] sm:$0xff]  ;;  %v2093_v25 = vld [vmem:[%s2027_s29 + $0x40] sm:$0xff] }
  0x84   : > { %v347_v18 = vsel %vm303_vm0, %v337_v14, 0.0  ;;  %v418_v20 = vmul.f32 %v2044_v2, %v2044_v2  ;;  %v425_v23 = vsel %vm303_vm0, %v417_v21, 0.0  ;;  %v469_v26 = vsel %vm303_vm0, %v2090_v24, 0.0  ;;  %v2112_v36 = vld [vmem:[%s2027_s29 + $0x70] sm:$0xff]  ;;  %v2115_v37 = vld [vmem:[%s2027_s29 + $0x60] sm:$0xff]  ;;  %v2128_v44 = vld [vmem:[%s2027_s29 + $0x58] sm:$0xff] }
  0x85   : > { %v466_v27 = vsel %vm303_vm0, %v2093_v25, 0.0  ;;  %v339_v28 = vmul.f32 %v2058_v8, %v2058_v8  ;;  %v338_v29 = vmul.f32 %v2061_v9, %v2061_v9  ;;  %v420_v32 = vmul.f32 %v2068_v12, %v2068_v12  ;;  %v2131_v45 = vld [vmem:[%s2027_s29 + $0x48] sm:$0xff]  ;;  %v2144_v52 = vld [vmem:[%s2027_s29 + $0x78] sm:$0xff]  ;;  %v2166_v3 = vld [vmem:[%s2027_s29 + $0x90] sm:$0xff]  ;;  %p286_p8 = scmp.lt.s32.totalorder %s1373_s24, 15  ;;  %s2655_s19 = smov (!%p284_p11, %s1794_s19), 1 }
  0x86   : > { %389 = vadd.xlane.f32.xlu1 %v388_v6  ;;  %308 = vadd.xlane.f32.xlu0 %v307_v7  ;;  %v428_v22 = vsel %vm303_vm0, %v418_v20, 0.0  ;;  %v419_v33 = vmul.f32 %v2071_v13, %v2071_v13  ;;  %v475_v38 = vsel %vm303_vm0, %v2112_v36, 0.0  ;;  %v472_v39 = vsel %vm303_vm0, %v2115_v37, 0.0  ;;  %v2147_v53 = vld [vmem:[%s2027_s29 + $0x68] sm:$0xff]  ;;  %2611 = vst [vmem:[#allocation10_spill] sm:$0xff] %v2166_v3  ;;  %v2169_v4 = vld [vmem:[%s2027_s29 + $0x80] sm:$0xff] }
  0x87   : > { %v353_v30 = vsel %vm303_vm0, %v339_v28, 0.0  ;;  %v350_v31 = vsel %vm303_vm0, %v338_v29, 0.0  ;;  %v434_v34 = vsel %vm303_vm0, %v420_v32, 0.0  ;;  %v499_v40 = vmul.f32 %v2090_v24, %v2090_v24  ;;  %2612 = vst [vmem:[#allocation11_spill] sm:$0xff] %v2169_v4  ;;  %v2196_v20 = vld [vmem:[%s2027_s29 + $0xb8] sm:$0xff]  ;;  %v2199_v21 = vld [vmem:[%s2027_s29 + $0xa8] sm:$0xff] }
  0x88   : > { %v431_v35 = vsel %vm303_vm0, %v419_v33, 0.0  ;;  %v498_v41 = vmul.f32 %v2093_v25, %v2093_v25  ;;  %v550_v46 = vsel %vm303_vm0, %v2128_v44, 0.0  ;;  %v547_v47 = vsel %vm303_vm0, %v2131_v45, 0.0  ;;  %2616 = vst [vmem:[#allocation15_spill] sm:$0xff] %v2196_v20  ;;  %2617 = vst [vmem:[#allocation16_spill] sm:$0xff] %v2199_v21  ;;  %s2657_s24 = smov (!%p286_p8, %s1373_s24), 15 }
  0x89   : > { %v509_v42 = vsel %vm303_vm0, %v499_v40, 0.0  ;;  %v501_v48 = vmul.f32 %v2112_v36, %v2112_v36  ;;  %v500_v49 = vmul.f32 %v2115_v37, %v2115_v37  ;;  %v556_v54 = vsel %vm303_vm0, %v2144_v52, 0.0  ;;  %s1374_s25 = sshll.u32 %s2655_s19, 4 }
  0x8a   : > { %314 = vadd.xlane.f32.xlu1 %v313_v10  ;;  %311 = vadd.xlane.f32.xlu0 %v310_v11  ;;  %v506_v43 = vsel %vm303_vm0, %v498_v41, 0.0  ;;  %v553_v55 = vsel %vm303_vm0, %v2147_v53, 0.0  ;;  %v580_v56 = vmul.f32 %v2128_v44, %v2128_v44  ;;  %v579_v57 = vmul.f32 %v2131_v45, %v2131_v45  ;;  %v2176_v10 = vld [vmem:[%s2027_s29 + $0x98] sm:$0xff]  ;;  %v2179_v11 = vld [vmem:[%s2027_s29 + $0x88] sm:$0xff]  ;;  %s289_s26 = sadd.s32 %s1374_s25, %s2657_s24 }
  0x8b   : > { %v515_v50 = vsel %vm303_vm0, %v501_v48, 0.0  ;;  %v512_v51 = vsel %vm303_vm0, %v500_v49, 0.0  ;;  %v582_v60 = vmul.f32 %v2144_v52, %v2144_v52  ;;  %v581_v61 = vmul.f32 %v2147_v53, %v2147_v53  ;;  %2613 = vst [vmem:[#allocation12_spill] sm:$0xff] %v2179_v11  ;;  %v1626_v48 = vld [vmem:[#allocation6 + $0x10] sm:$0xff]   ;;  %v1627_v49 = vld [vmem:[#allocation6 + $0x20] sm:$0xff]   ;;  %s1375_s23 = sshll.u32 %s289_s26, 3 }
  0x8c   : > { %v590_v58 = vsel %vm303_vm0, %v580_v56, 0.0  ;;  %v587_v59 = vsel %vm303_vm0, %v579_v57, 0.0  ;;  %v319_v6 = vsel %vm303_vm0, %v2166_v3, 0.0  ;;  %v316_v7 = vsel %vm303_vm0, %v2169_v4, 0.0  ;;  %1456 = vmatprep.subr.bf16.mxu1 %v1626_v48  ;;  %1480 = vmatprep.subr.bf16.mxu0 %v1627_v49  ;;  %v2240_v56 = vld [vmem:[%s2027_s29 + $0xf0] sm:$0xff]  ;;  %v2243_v57 = vld [vmem:[%s2027_s29 + $0xe0] sm:$0xff]  ;;  %s2531_s18 = scalar_lea.vmem %s2577_s4, %s1375_s23 }
  0x8d   : > { %v596_v62 = vsel %vm303_vm0, %v582_v60, 0.0  ;;  %v593_v63 = vsel %vm303_vm0, %v581_v61, 0.0  ;;  %v400_v14 = vsel %vm303_vm0, %v2176_v10, 0.0  ;;  %v397_v15 = vsel %vm303_vm0, %v2179_v11, 0.0  ;;  %2619 = vst [vmem:[#allocation18_spill] sm:$0xff] %v2240_v56  ;;  %2620 = vst [vmem:[#allocation19_spill] sm:$0xff] %v2243_v57  ;;  %1457 = vmatpush3.bf16.msra.mxu1 %v1626_v48  ;;  %1481 = vmatpush3.bf16.msra.mxu0 %v1627_v49 }
  0x8e   : > { %395 = vadd.xlane.f32.xlu1 %v394_v16  ;;  %392 = vadd.xlane.f32.xlu0 %v391_v17  ;;  %v2186_v16 = vld [vmem:[%s2027_s29 + $0xb0] sm:$0xff]  ;;  %v2189_v17 = vld [vmem:[%s2027_s29 + $0xa0] sm:$0xff]  ;;  %vm1224_vm1 = vcmask 523264  }
  0x8f   : > { %2614 = vst [vmem:[#allocation13_spill] sm:$0xff] %v2186_v16  ;;  %2615 = vst [vmem:[#allocation14_spill] sm:$0xff] %v2189_v17  ;;  %v343_v40 = vmul.f32 %v2186_v16, %v2186_v16  ;;  %v342_v41 = vmul.f32 %v2189_v17, %v2189_v17 }
  0x92   : > { %348 = vadd.xlane.f32.xlu1 %v347_v18  ;;  %345 = vadd.xlane.f32.xlu0 %v344_v19  ;;  %v325_v18 = vsel %vm303_vm0, %v2186_v16, 0.0  ;;  %v322_v19 = vsel %vm303_vm0, %v2189_v17, 0.0 }
  0x96   : > { %429 = vadd.xlane.f32.xlu1 %v428_v22  ;;  %426 = vadd.xlane.f32.xlu0 %v425_v23  ;;  %v406_v22 = vsel %vm303_vm0, %v2196_v20, 0.0  ;;  %v403_v23 = vsel %vm303_vm0, %v2199_v21, 0.0 }
  0x9a   : > { %470 = vadd.xlane.f32.xlu1 %v469_v26  ;;  %467 = vadd.xlane.f32.xlu0 %v466_v27  ;;  %v341_v26 = vmul.f32 %v2166_v3, %v2166_v3  ;;  %v340_v27 = vmul.f32 %v2169_v4, %v2169_v4 }
  0x9c   : > { %v359_v28 = vsel %vm303_vm0, %v341_v26, 0.0  ;;  %v356_v29 = vsel %vm303_vm0, %v340_v27, 0.0  ;;  %v2272_v26 = vld [vmem:[%s2027_s29 + $0xf8] sm:$0xff]  ;;  %v2275_v27 = vld [vmem:[%s2027_s29 + $0xe8] sm:$0xff] }
  0x9d   : > { %2623 = vst [vmem:[#allocation22_spill] sm:$0xff] %v2272_v26  ;;  %2624 = vst [vmem:[#allocation23_spill] sm:$0xff] %v2275_v27 }
  0x9e   : > { %354 = vadd.xlane.f32.xlu1 %v353_v30  ;;  %351 = vadd.xlane.f32.xlu0 %v350_v31  ;;  %v422_v30 = vmul.f32 %v2176_v10, %v2176_v10  ;;  %v421_v31 = vmul.f32 %v2179_v11, %v2179_v11 }
  0xa0   : > { %v440_v32 = vsel %vm303_vm0, %v422_v30, 0.0  ;;  %v437_v33 = vsel %vm303_vm0, %v421_v31, 0.0 }
  0xa2   : > { %435 = vadd.xlane.f32.xlu1 %v434_v34  ;;  %432 = vadd.xlane.f32.xlu0 %v431_v35  ;;  %v2218_v34 = vld [vmem:[%s2027_s29 + $0xd0] sm:$0xff]  ;;  %v2221_v35 = vld [vmem:[%s2027_s29 + $0xc0] sm:$0xff] }
  0xa3   : > { %2618 = vst [vmem:[#allocation17_spill] sm:$0xff] %v2221_v35  ;;  %v503_v60 = vmul.f32 %v2218_v34, %v2218_v34  ;;  %v502_v61 = vmul.f32 %v2221_v35, %v2221_v35 }
  0xa6   : > { %476 = vadd.xlane.f32.xlu1 %v475_v38  ;;  %473 = vadd.xlane.f32.xlu0 %v472_v39  ;;  %v481_v38 = vsel %vm303_vm0, %v2218_v34, 0.0  ;;  %v478_v39 = vsel %vm303_vm0, %v2221_v35, 0.0 }
  0xaa   : > { %510 = vadd.xlane.f32.xlu1 %v509_v42  ;;  %507 = vadd.xlane.f32.xlu0 %v506_v43  ;;  %v365_v42 = vsel %vm303_vm0, %v343_v40, 0.0  ;;  %v362_v43 = vsel %vm303_vm0, %v342_v41, 0.0 }
  0xae   : > { %551 = vadd.xlane.f32.xlu1 %v550_v46  ;;  %548 = vadd.xlane.f32.xlu0 %v547_v47  ;;  %v424_v46 = vmul.f32 %v2196_v20, %v2196_v20  ;;  %v423_v47 = vmul.f32 %v2199_v21, %v2199_v21 }
  0xb2   : > { %516 = vadd.xlane.f32.xlu1 %v515_v50  ;;  %513 = vadd.xlane.f32.xlu0 %v512_v51  ;;  %v446_v50 = vsel %vm303_vm0, %v424_v46, 0.0  ;;  %v443_v51 = vsel %vm303_vm0, %v423_v47, 0.0 }
  0xb6   : > { %557 = vadd.xlane.f32.xlu1 %v556_v54  ;;  %554 = vadd.xlane.f32.xlu0 %v553_v55  ;;  %v1628_v54 = vld [vmem:[#allocation6 + $0x18] sm:$0xff]   ;;  %v1629_v55 = vld [vmem:[#allocation6 + $0x28] sm:$0xff]  }
  0xb7   : > { %1458 = vmatprep.subr.bf16.mxu1 %v1628_v54  ;;  %1482 = vmatprep.subr.bf16.mxu0 %v1629_v55 }
  0xb8   : > { %1459 = vmatpush3.bf16.msra.mxu1 %v1628_v54  ;;  %1483 = vmatpush3.bf16.msra.mxu0 %v1629_v55 }
  0xba   : > { %591 = vadd.xlane.f32.xlu1 %v590_v58  ;;  %588 = vadd.xlane.f32.xlu0 %v587_v59  ;;  %v487_v58 = vsel %vm303_vm0, %v2240_v56, 0.0  ;;  %v484_v59 = vsel %vm303_vm0, %v2243_v57, 0.0 }
  0xbe   : > { %597 = vadd.xlane.f32.xlu1 %v596_v62  ;;  %594 = vadd.xlane.f32.xlu0 %v593_v63  ;;  %v521_v62 = vsel %vm303_vm0, %v503_v60, 0.0  ;;  %v518_v63 = vsel %vm303_vm0, %v502_v61, 0.0 }
  0xc2   : > { %320 = vadd.xlane.f32.xlu1 %v319_v6  ;;  %317 = vadd.xlane.f32.xlu0 %v316_v7  ;;  %v2256_v6 = vld [vmem:[%s2027_s29 + $0xd8] sm:$0xff]  ;;  %v2259_v7 = vld [vmem:[%s2027_s29 + $0xc8] sm:$0xff] }
  0xc3   : > { %2621 = vst [vmem:[#allocation20_spill] sm:$0xff] %v2256_v6  ;;  %2622 = vst [vmem:[#allocation21_spill] sm:$0xff] %v2259_v7  ;;  %v584_v30 = vmul.f32 %v2256_v6, %v2256_v6  ;;  %v583_v31 = vmul.f32 %v2259_v7, %v2259_v7 }
  0xc6   : > { %401 = vadd.xlane.f32.xlu1 %v400_v14  ;;  %398 = vadd.xlane.f32.xlu0 %v397_v15  ;;  %v562_v14 = vsel %vm303_vm0, %v2256_v6, 0.0  ;;  %v559_v15 = vsel %vm303_vm0, %v2259_v7, 0.0 }
  0xca   : > { %326 = vadd.xlane.f32.xlu1 %v325_v18  ;;  %323 = vadd.xlane.f32.xlu0 %v322_v19  ;;  %v505_v18 = vmul.f32 %v2240_v56, %v2240_v56  ;;  %v504_v19 = vmul.f32 %v2243_v57, %v2243_v57 }
  0xce   : > { %407 = vadd.xlane.f32.xlu1 %v406_v22  ;;  %404 = vadd.xlane.f32.xlu0 %v403_v23  ;;  %v527_v22 = vsel %vm303_vm0, %v505_v18, 0.0  ;;  %v524_v23 = vsel %vm303_vm0, %v504_v19, 0.0 }
  0xd2   : > { %360 = vadd.xlane.f32.xlu1 %v359_v28  ;;  %357 = vadd.xlane.f32.xlu0 %v356_v29  ;;  %v568_v28 = vsel %vm303_vm0, %v2272_v26, 0.0  ;;  %v565_v29 = vsel %vm303_vm0, %v2275_v27, 0.0 }
  0xd6   : > { %441 = vadd.xlane.f32.xlu1 %v440_v32  ;;  %438 = vadd.xlane.f32.xlu0 %v437_v33  ;;  %v602_v32 = vsel %vm303_vm0, %v584_v30, 0.0  ;;  %v599_v33 = vsel %vm303_vm0, %v583_v31, 0.0 }
  0xda   : > { %482 = vadd.xlane.f32.xlu1 %v481_v38  ;;  %479 = vadd.xlane.f32.xlu0 %v478_v39  ;;  %v586_v38 = vmul.f32 %v2272_v26, %v2272_v26  ;;  %v585_v39 = vmul.f32 %v2275_v27, %v2275_v27 }
  0xdc   : > { %v608_v40 = vsel %vm303_vm0, %v586_v38, 0.0  ;;  %v605_v41 = vsel %vm303_vm0, %v585_v39, 0.0 }
  0xde   : > { %366 = vadd.xlane.f32.xlu1 %v365_v42  ;;  %363 = vadd.xlane.f32.xlu0 %v362_v43 }
  0xe2   : > { %447 = vadd.xlane.f32.xlu1 %v446_v50  ;;  %444 = vadd.xlane.f32.xlu0 %v443_v51  ;;  %v2293_v50 = vld [vmem:[#allocation6] sm:$0xff]   ;;  %v2295_v51 = vld [vmem:[#allocation6 + $0x30] sm:$0xff]  }
  0xe3   : > { %1468 = vmatprep.subr.bf16.mxu1 %v2293_v50  ;;  %1492 = vmatprep.subr.bf16.mxu0 %v2295_v51 }
  0xe6   : > { %488 = vadd.xlane.f32.xlu1 %v487_v58  ;;  %485 = vadd.xlane.f32.xlu0 %v484_v59 }
  0xea   : > { %522 = vadd.xlane.f32.xlu1 %v521_v62  ;;  %519 = vadd.xlane.f32.xlu0 %v518_v63 }
  0xee   : > { %563 = vadd.xlane.f32.xlu1 %v562_v14  ;;  %560 = vadd.xlane.f32.xlu0 %v559_v15 }
  0xf2   : > { %528 = vadd.xlane.f32.xlu1 %v527_v22  ;;  %525 = vadd.xlane.f32.xlu0 %v524_v23 }
  0xf6   : > { %569 = vadd.xlane.f32.xlu1 %v568_v28  ;;  %566 = vadd.xlane.f32.xlu0 %v565_v29 }
  0xfa   : > { %603 = vadd.xlane.f32.xlu1 %v602_v32  ;;  %600 = vadd.xlane.f32.xlu0 %v599_v33 }
  0xfe   : > { %609 = vadd.xlane.f32.xlu1 %v608_v40  ;;  %606 = vadd.xlane.f32.xlu0 %v605_v41 }
 0x10f   : > { %v387_v42 = vpop.xlane.xlu1 %386  ;;  %v306_v43 = vpop.xlane.xlu0 %305 }
 0x110   : > { %v409_v32 = vadd.f32 %v387_v42, %v306_v43 }
 0x113   : > { %v390_v46 = vpop.xlane.xlu1 %389  ;;  %v309_v47 = vpop.xlane.xlu0 %308 }
 0x114   : > { %v410_v33 = vadd.f32 %v390_v46, %v309_v47 }
 0x117   : > { %v315_v48 = vpop.xlane.xlu1 %314  ;;  %v312_v49 = vpop.xlane.xlu0 %311 }
 0x11b   : > { %v396_v54 = vpop.xlane.xlu1 %395  ;;  %v393_v55 = vpop.xlane.xlu0 %392 }
 0x11c   : > { %v412_v26 = vadd.f32 %v396_v54, %v315_v48  ;;  %v411_v27 = vadd.f32 %v393_v55, %v312_v49 }
 0x11f   : > { %v349_v58 = vpop.xlane.xlu1 %348  ;;  %v346_v59 = vpop.xlane.xlu0 %345 }
 0x123   : > { %v430_v60 = vpop.xlane.xlu1 %429  ;;  %v427_v61 = vpop.xlane.xlu0 %426 }
 0x124   : > { %v450_v56 = vadd.f32 %v430_v60, %v349_v58  ;;  %v449_v57 = vadd.f32 %v427_v61, %v346_v59 }
 0x127   : > { %v471_v62 = vpop.xlane.xlu1 %470  ;;  %v468_v63 = vpop.xlane.xlu0 %467 }
 0x128   : > { %v491_v40 = vadd.f32 %v471_v62, %v410_v33  ;;  %v490_v41 = vadd.f32 %v468_v63, %v409_v32 }
 0x12b   : > { %v355_v14 = vpop.xlane.xlu1 %354  ;;  %v352_v15 = vpop.xlane.xlu0 %351 }
 0x12f   : > { %v436_v18 = vpop.xlane.xlu1 %435  ;;  %v433_v19 = vpop.xlane.xlu0 %432 }
 0x130   : > { %v452_v48 = vadd.f32 %v436_v18, %v355_v14  ;;  %v451_v49 = vadd.f32 %v433_v19, %v352_v15 }
 0x133   : > { %v477_v22 = vpop.xlane.xlu1 %476  ;;  %v474_v23 = vpop.xlane.xlu0 %473 }
 0x134   : > { %v493_v3 = vadd.f32 %v477_v22, %v412_v26  ;;  %v492_v4 = vadd.f32 %v474_v23, %v411_v27 }
 0x137   : > { %v511_v28 = vpop.xlane.xlu1 %510  ;;  %v508_v29 = vpop.xlane.xlu0 %507 }
 0x138   : > { %v531_v35 = vadd.f32 %v511_v28, %v450_v56  ;;  %v530_v11 = vadd.f32 %v508_v29, %v449_v57 }
 0x13b   : > { %v552_v30 = vpop.xlane.xlu1 %551  ;;  %v549_v31 = vpop.xlane.xlu0 %548 }
 0x13c   : > { %v572_v16 = vadd.f32 %v552_v30, %v491_v40  ;;  %v571_v17 = vadd.f32 %v549_v31, %v490_v41  ;;  %v2327_v40 = vld [vmem:[#allocation4 + $0x1] ss:$0 sm:$0xff] }
 0x13e   : > { %v2299_v42 = vmul.f32 0.0078125, %v572_v16  ;;  %v2301_v43 = vmul.f32 0.0078125, %v571_v17 }
 0x13f   : > { %v517_v38 = vpop.xlane.xlu1 %516  ;;  %v514_v39 = vpop.xlane.xlu0 %513 }
 0x140   : > { %v533_v62 = vadd.f32 %v517_v38, %v452_v48  ;;  %v532_v63 = vadd.f32 %v514_v39, %v451_v49  ;;  %v635_v16 = vmul.f32 %v2301_v43, %v2301_v43  ;;  %v715_v48 = vsub.f32 %v2044_v2, %v2299_v42 }
 0x141   : > { %v933_v49 = vsub.f32 %v2093_v25, %v2301_v43  ;;  %v1071_v2 = vsub.f32 %v2131_v45, %v2301_v43  ;;  %v1072_v25 = vsub.f32 %v2128_v44, %v2299_v42 }
 0x143   : > { %v558_v6 = vpop.xlane.xlu1 %557  ;;  %v555_v7 = vpop.xlane.xlu0 %554 }
 0x144   : > { %v574_v20 = vadd.f32 %v558_v6, %v493_v3  ;;  %v573_v21 = vadd.f32 %v555_v7, %v492_v4  ;;  %v636_v4 = vmul.f32 %v2299_v42, %v2299_v42 }
 0x146   : > { %v2303_v26 = vmul.f32 0.0078125, %v574_v20  ;;  %v2305_v27 = vmul.f32 0.0078125, %v573_v21 }
 0x147   : > { %v592_v46 = vpop.xlane.xlu1 %591  ;;  %v589_v47 = vpop.xlane.xlu0 %588 }
 0x148   : > { %v612_v54 = vadd.f32 %v592_v46, %v531_v35  ;;  %v611_v55 = vadd.f32 %v589_v47, %v530_v11  ;;  %v638_v20 = vmul.f32 %v2303_v26, %v2303_v26  ;;  %v637_v21 = vmul.f32 %v2305_v27, %v2305_v27 }
 0x149   : > { %v714_v47 = vsub.f32 %v2038_v0, %v2301_v43  ;;  %v676_v0 = vsub.f32 %v2051_v5, %v2299_v42 }
 0x14a   : > { %v628_v3 = vmul.f32 0.0078125, %v612_v54  ;;  %v627_v17 = vmul.f32 0.0078125, %v611_v55  ;;  %v934_v54 = vsub.f32 %v2090_v24, %v2299_v42  ;;  %v2341_v55 = vld [vmem:[#allocation4 + $0x2] ss:$0 sm:$0xff]  ;;  %v716_v24 = vsub.f32 %v2071_v13, %v2305_v27 }
 0x14b   : > { %v598_v56 = vpop.xlane.xlu1 %597  ;;  %v595_v57 = vpop.xlane.xlu0 %594 }
 0x14c   : > { %v614_v6 = vadd.f32 %v598_v56, %v533_v62  ;;  %v613_v7 = vadd.f32 %v595_v57, %v532_v63  ;;  %v644_v35 = vsub.f32 %v628_v3, %v636_v4  ;;  %v643_v11 = vsub.f32 %v627_v17, %v635_v16  ;;  %v2343_v62 = vld [vmem:[#allocation4] ss:$0 sm:$0xff]  ;;  %v2345_v63 = vld [vmem:[#allocation4 + $0x3] ss:$0 sm:$0xff] }
 0x14d   : > { %v675_v3 = vsub.f32 %v2041_v1, %v2301_v43  ;;  %v717_v16 = vsub.f32 %v2068_v12, %v2303_v26  ;;  %v935_v17 = vsub.f32 %v2115_v37, %v2305_v27  ;;  %v936_v1 = vsub.f32 %v2112_v36, %v2303_v26 }
 0x14e   : > { %v630_v58 = vmul.f32 0.0078125, %v614_v6  ;;  %v629_v59 = vmul.f32 0.0078125, %v613_v7  ;;  %v652_v60 = vmax.f32 %v644_v35, 0.0  ;;  %v651_v61 = vmax.f32 %v643_v11, 0.0 }
 0x14f   : > { %v2315_v14 = vpop.xlane.xlu1 %320  ;;  %v2317_v15 = vpop.xlane.xlu0 %317 }
 0x150   : > { %v646_v18 = vsub.f32 %v630_v58, %v638_v20  ;;  %v645_v19 = vsub.f32 %v629_v59, %v637_v21  ;;  %v660_v22 = vadd.f32 1e-05, %v652_v60  ;;  %v659_v23 = vadd.f32 1e-05, %v651_v61 }
 0x152   : > { %v654_v28 = vmax.f32 %v646_v18, 0.0  ;;  %v653_v29 = vmax.f32 %v645_v19, 0.0  ;;  %1634 = vrsqrt.f32 %v660_v22 }
 0x153   : > { %v2319_v30 = vpop.xlane.xlu1 %401  ;;  %v2321_v31 = vpop.xlane.xlu0 %398  ;;  %1636 = vrsqrt.f32 %v659_v23 }
 0x154   : > { %v662_v32 = vadd.f32 1e-05, %v654_v28  ;;  %v661_v33 = vadd.f32 1e-05, %v653_v29 }
 0x156   : > { %1638 = vrsqrt.f32 %v662_v32 }
 0x157   : > { %1640 = vrsqrt.f32 %v661_v33  ;;  %v2323_v38 = vpop.xlane.xlu1 %326  ;;  %v2325_v39 = vpop.xlane.xlu0 %323 }
 0x15b   : > { %v2329_v41 = vpop.xlane.xlu1 %407  ;;  %v2331_v46 = vpop.xlane.xlu0 %404 }
 0x15c   : > { %v1635_v4 = vpop.eup %1634 }
 0x15d   : > { %v1637_v5 = vpop.eup %1636  ;;  %v731_v56 = vmul.f32 %v1635_v4, %v2327_v40  ;;  %v950_v45 = vmul.f32 %v1635_v4, %v2341_v55  ;;  %v691_v44 = vmul.f32 %v1635_v4, %v2343_v62  ;;  %v1088_v42 = vmul.f32 %v1635_v4, %v2345_v63 }
 0x15e   : > { %v730_v12 = vmul.f32 %v1637_v5, %v2327_v40  ;;  %v949_v37 = vmul.f32 %v1637_v5, %v2341_v55  ;;  %v690_v57 = vmul.f32 %v1637_v5, %v2343_v62  ;;  %v1087_v36 = vmul.f32 %v1637_v5, %v2345_v63  ;;  %v1633_v5 = vld [vmem:[#allocation6 + $0x38] sm:$0xff]  }
 0x15f   : > { %v2367_v43 = vpop.xlane.xlu1 %360  ;;  %v2369_v13 = vpop.xlane.xlu0 %357  ;;  %v739_v7 = vmul.f32 %v731_v56, %v715_v48  ;;  %v958_v35 = vmul.f32 %v950_v45, %v934_v54  ;;  %v2375_v11 = vmul.f32 %v691_v44, %v676_v0  ;;  %v2377_v20 = vmul.f32 %v1088_v42, %v1072_v25 }
 0x160   : > { %v1639_v6 = vpop.eup %1638  ;;  %v738_v21 = vmul.f32 %v730_v12, %v714_v47  ;;  %v957_v59 = vmul.f32 %v949_v37, %v933_v49  ;;  %v2383_v22 = vmul.f32 %v690_v57, %v675_v3  ;;  %v2385_v23 = vmul.f32 %v1087_v36, %v1071_v2 }
 0x161   : > { %v1641_v58 = vpop.eup %1640  ;;  %v733_v60 = vmul.f32 %v1639_v6, %v2327_v40  ;;  %v952_v61 = vmul.f32 %v1639_v6, %v2341_v55  ;;  %v678_v49 = vsub.f32 %v2058_v8, %v2303_v26  ;;  %v677_v54 = vsub.f32 %v2061_v9, %v2305_v27  ;;  %v1632_v8 = vld [vmem:[#allocation6 + $0x8] sm:$0xff]  }
 0x162   : > { %v732_v18 = vmul.f32 %v1641_v58, %v2327_v40  ;;  %v951_v19 = vmul.f32 %v1641_v58, %v2341_v55  ;;  %v746_v29 = vpack.c.bf16 %v739_v7, %v738_v21  ;;  %v965_v32 = vpack.c.bf16 %v958_v35, %v957_v59 }
 0x163   : > { %v2387_v28 = vpop.xlane.xlu1 %441  ;;  %v439_v33 = vpop.xlane.xlu0 %438  ;;  %v741_v48 = vmul.f32 %v733_v60, %v717_v16  ;;  %v960_v47 = vmul.f32 %v952_v61, %v936_v1  ;;  %v706_v3 = vpack.c.bf16 %v2375_v11, %v2383_v22  ;;  %v1103_v2 = vpack.c.bf16 %v2377_v20, %v2385_v23 }
 0x164   : > { %v740_v0 = vmul.f32 %v732_v18, %v716_v24  ;;  %v959_v25 = vmul.f32 %v951_v19, %v935_v17  ;;  %1460 = vmatprep.mubr.msk.bf16.mxu1 %vm303_vm0, %v746_v29  ;;  %1484 = vmatprep.mubr.msk.bf16.mxu0 %vm303_vm0, %v965_v32  ;;  %v692_v4 = vmul.f32 %v1641_v58, %v2343_v62 }
 0x165   : > { %v693_v9 = vmul.f32 %v1639_v6, %v2343_v62  ;;  %v1089_v24 = vmul.f32 %v1641_v58, %v2345_v63  ;;  %v1074_v17 = vsub.f32 %v2144_v52, %v2303_v26  ;;  %v1073_v56 = vsub.f32 %v2147_v53, %v2305_v27 }
 0x166   : > { %v747_v16 = vpack.c.bf16 %v741_v48, %v740_v0  ;;  %v966_v1 = vpack.c.bf16 %v960_v47, %v959_v25  ;;  %v2406_v42 = vmul.f32 %v692_v4, %v677_v54  ;;  %v1090_v12 = vmul.f32 %v1639_v6, %v2345_v63 }
 0x167   : > { %v483_v45 = vpop.xlane.xlu1 %482  ;;  %v480_v44 = vpop.xlane.xlu0 %479  ;;  %v2411_v37 = vmul.f32 %v693_v9, %v678_v49  ;;  %v2415_v52 = vmul.f32 %v1089_v24, %v1073_v56  ;;  %v414_v60 = vadd.f32 %v2319_v30, %v2315_v14  ;;  %v413_v61 = vadd.f32 %v2321_v31, %v2317_v15 }
 0x168   : > { %1461 = vmatmul.mubr.msk.bf16.vlgmr.msra.gmra.mrb[0].mxu1 %vm303_vm0, %v747_v16  ;;  %1485 = vmatmul.mubr.msk.bf16.vlgmr.msra.gmra.mrb[0].mxu0 %vm303_vm0, %v966_v1  ;;  %v2417_v26 = vmul.f32 %v1090_v12, %v1074_v17  ;;  %v416_v48 = vadd.f32 %v2329_v41, %v2323_v38  ;;  %v415_v47 = vadd.f32 %v2331_v46, %v2325_v39 }
 0x169   : > { %1469 = vmatpush3.bf16.msra.mxu1 %v2293_v50  ;;  %1493 = vmatpush3.bf16.msra.mxu0 %v2295_v51  ;;  %v707_v53 = vpack.c.bf16 %v2411_v37, %v2406_v42  ;;  %v495_v29 = vadd.f32 %v483_v45, %v414_v60  ;;  %v494_v32 = vadd.f32 %v480_v44, %v413_v61 }
 0x16a   : > { %1470 = vmatprep.subr.bf16.mxu1 %v1632_v8  ;;  %1494 = vmatprep.subr.bf16.mxu0 %v1633_v5  ;;  %v1104_v36 = vpack.c.bf16 %v2417_v26, %v2415_v52  ;;  %v454_v14 = vadd.f32 %v2387_v28, %v2367_v43  ;;  %v453_v15 = vadd.f32 %v439_v33, %v2369_v13 }
 0x16b   : > { %v367_v27 = vpop.xlane.xlu1 %366  ;;  %v364_v57 = vpop.xlane.xlu0 %363 }
 0x16d   : > { %1471 = vmatpush3.bf16.msra.mxu1 %v1632_v8  ;;  %1495 = vmatpush3.bf16.msra.mxu0 %v1633_v5 }
 0x16f   : > { %v448_v6 = vpop.xlane.xlu1 %447  ;;  %v445_v50 = vpop.xlane.xlu0 %444 }
 0x170   : > { %v456_v39 = vadd.f32 %v448_v6, %v367_v27  ;;  %v455_v41 = vadd.f32 %v445_v50, %v364_v57 }
 0x173   : > { %v489_v7 = vpop.xlane.xlu1 %488  ;;  %v486_v51 = vpop.xlane.xlu0 %485 }
 0x174   : > { %v497_v0 = vadd.f32 %v489_v7, %v416_v48  ;;  %v496_v25 = vadd.f32 %v486_v51, %v415_v47 }
 0x177   : > { %v523_v35 = vpop.xlane.xlu1 %522  ;;  %v520_v58 = vpop.xlane.xlu0 %519 }
 0x178   : > { %v535_v1 = vadd.f32 %v523_v35, %v454_v14  ;;  %v534_v8 = vadd.f32 %v520_v58, %v453_v15 }
 0x17b   : > { %v564_v21 = vpop.xlane.xlu1 %563  ;;  %v561_v59 = vpop.xlane.xlu0 %560 }
 0x17c   : > { %v576_v49 = vadd.f32 %v564_v21, %v495_v29  ;;  %v575_v54 = vadd.f32 %v561_v59, %v494_v32 }
 0x17e   : > { %v2434_v5 = vmul.f32 0.0078125, %v576_v49  ;;  %v2436_v38 = vmul.f32 0.0078125, %v575_v54 }
 0x17f   : > { %v529_v18 = vpop.xlane.xlu1 %528  ;;  %v526_v19 = vpop.xlane.xlu0 %525 }
 0x180   : > { %v537_v56 = vadd.f32 %v529_v18, %v456_v39  ;;  %v536_v45 = vadd.f32 %v526_v19, %v455_v41  ;;  %v640_v13 = vmul.f32 %v2434_v5, %v2434_v5  ;;  %v639_v33 = vmul.f32 %v2436_v38, %v2436_v38 }
 0x181   : > { %v938_v14 = vsub.f32 %v2218_v34, %v2434_v5 }
 0x183   : > { %v570_v4 = vpop.xlane.xlu1 %569  ;;  %v567_v16 = vpop.xlane.xlu0 %566 }
 0x184   : > { %v578_v30 = vadd.f32 %v570_v4, %v497_v0  ;;  %v577_v31 = vadd.f32 %v567_v16, %v496_v25  ;;  %v719_v4 = vsub.f32 %v2176_v10, %v2434_v5 }
 0x186   : > { %v2438_v44 = vmul.f32 0.0078125, %v578_v30  ;;  %v2440_v43 = vmul.f32 0.0078125, %v577_v31  ;;  %v2625_v30 = vld [vmem:[#allocation12_spill] sm:$0xff] }
 0x187   : > { %v604_v46 = vpop.xlane.xlu1 %603  ;;  %v601_v9 = vpop.xlane.xlu0 %600  ;;  %v718_v31 = vsub.f32 %v2625_v30, %v2436_v38 }
 0x188   : > { %v616_v24 = vadd.f32 %v604_v46, %v535_v1  ;;  %v615_v17 = vadd.f32 %v601_v9, %v534_v8  ;;  %v642_v35 = vmul.f32 %v2438_v44, %v2438_v44  ;;  %v641_v58 = vmul.f32 %v2440_v43, %v2440_v43  ;;  %v2626_v8 = vld [vmem:[#allocation17_spill] sm:$0xff] }
 0x189   : > { %v937_v39 = vsub.f32 %v2626_v8, %v2436_v38 }
 0x18a   : > { %v632_v28 = vmul.f32 0.0078125, %v616_v24  ;;  %v631_v12 = vmul.f32 0.0078125, %v615_v17 }
 0x18b   : > { %v610_v27 = vpop.xlane.xlu1 %609  ;;  %v607_v57 = vpop.xlane.xlu0 %606 }
 0x18c   : > { %v648_v6 = vsub.f32 %v632_v28, %v640_v13  ;;  %v647_v50 = vsub.f32 %v631_v12, %v639_v33  ;;  %v618_v7 = vadd.f32 %v610_v27, %v537_v56  ;;  %v617_v51 = vadd.f32 %v607_v57, %v536_v45  ;;  %v2627_v56 = vld [vmem:[#allocation16_spill] sm:$0xff]  ;;  %v2628_v45 = vld [vmem:[#allocation15_spill] sm:$0xff]  ;;  %v2630_v57 = vld [vmem:[#allocation18_spill] sm:$0xff] }
 0x18d   : > { %v720_v34 = vsub.f32 %v2627_v56, %v2440_v43  ;;  %v721_v13 = vsub.f32 %v2628_v45, %v2438_v44  ;;  %v2629_v12 = vld [vmem:[#allocation19_spill] sm:$0xff] }
 0x18e   : > { %v656_v21 = vmax.f32 %v648_v6, 0.0  ;;  %v655_v59 = vmax.f32 %v647_v50, 0.0  ;;  %v634_v60 = vmul.f32 0.0078125, %v618_v7  ;;  %v633_v61 = vmul.f32 0.0078125, %v617_v51 }
 0x18f   : > { %v939_v27 = vsub.f32 %v2629_v12, %v2440_v43  ;;  %v940_v6 = vsub.f32 %v2630_v57, %v2438_v44 }
 0x190   : > { %v664_v18 = vadd.f32 1e-05, %v656_v21  ;;  %v663_v19 = vadd.f32 1e-05, %v655_v59  ;;  %v650_v29 = vsub.f32 %v634_v60, %v642_v35  ;;  %v649_v32 = vsub.f32 %v633_v61, %v641_v58 }
 0x192   : > { %1642 = vrsqrt.f32 %v664_v18  ;;  %v658_v48 = vmax.f32 %v650_v29, 0.0  ;;  %v657_v47 = vmax.f32 %v649_v32, 0.0 }
 0x193   : > { %1644 = vrsqrt.f32 %v663_v19 }
 0x194   : > { %v666_v49 = vadd.f32 1e-05, %v658_v48  ;;  %v665_v54 = vadd.f32 1e-05, %v657_v47 }
 0x196   : > { %1646 = vrsqrt.f32 %v666_v49  ;;  %v2632_v49 = vld [vmem:[#allocation10_spill] sm:$0xff] }
 0x197   : > { %1648 = vrsqrt.f32 %v665_v54  ;;  %v680_v54 = vsub.f32 %v2632_v49, %v2434_v5 }
 0x19c   : > { %v1643_v0 = vpop.eup %1642 }
 0x19d   : > { %v1645_v25 = vpop.eup %1644  ;;  %v735_v16 = vmul.f32 %v1643_v0, %v2327_v40  ;;  %v954_v15 = vmul.f32 %v1643_v0, %v2341_v55  ;;  %v695_v32 = vmul.f32 %v1643_v0, %v2343_v62 }
 0x19e   : > { %v734_v1 = vmul.f32 %v1645_v25, %v2327_v40  ;;  %v953_v41 = vmul.f32 %v1645_v25, %v2341_v55  ;;  %v694_v29 = vmul.f32 %v1645_v25, %v2343_v62  ;;  %v1091_v48 = vmul.f32 %v1645_v25, %v2345_v63 }
 0x19f   : > { %v743_v46 = vmul.f32 %v735_v16, %v719_v4  ;;  %v962_v9 = vmul.f32 %v954_v15, %v938_v14  ;;  %v2634_v4 = vld [vmem:[#allocation20_spill] sm:$0xff]  ;;  %v703_v15 = vmul.f32 %v695_v32, %v680_v54 }
 0x1a0   : > { %v1647_v10 = vpop.eup %1646  ;;  %v742_v24 = vmul.f32 %v734_v1, %v718_v31  ;;  %v961_v17 = vmul.f32 %v953_v41, %v937_v39  ;;  %v1076_v16 = vsub.f32 %v2634_v4, %v2434_v5  ;;  %v2635_v1 = vld [vmem:[#allocation14_spill] sm:$0xff]  ;;  %v2637_v5 = vld [vmem:[#allocation23_spill] sm:$0xff] }
 0x1a1   : > { %v1649_v28 = vpop.eup %1648  ;;  %v737_v33 = vmul.f32 %v1647_v10, %v2327_v40  ;;  %v956_v50 = vmul.f32 %v1647_v10, %v2341_v55  ;;  %v1094_v23 = vmul.f32 %v1647_v10, %v2345_v63  ;;  %v1077_v8 = vsub.f32 %v2637_v5, %v2440_v43  ;;  %v2638_v39 = vld [vmem:[#allocation22_spill] sm:$0xff] }
 0x1a2   : > { %v748_v7 = vpack.c.bf16 %v743_v46, %v742_v24  ;;  %v967_v51 = vpack.c.bf16 %v962_v9, %v961_v17  ;;  %v736_v35 = vmul.f32 %v1649_v28, %v2327_v40  ;;  %v955_v58 = vmul.f32 %v1649_v28, %v2341_v55  ;;  %v2631_v55 = vld [vmem:[#allocation11_spill] sm:$0xff]  ;;  %v1428_v46 = vld [vmem:[%s2575_s2] ss:$0 sm:$0xff] }
 0x1a3   : > { %v745_v21 = vmul.f32 %v737_v33, %v721_v13  ;;  %v964_v59 = vmul.f32 %v956_v50, %v940_v6  ;;  %v1092_v40 = vmul.f32 %v1643_v0, %v2345_v63  ;;  %v679_v47 = vsub.f32 %v2631_v55, %v2436_v38  ;;  %v2633_v0 = vld [vmem:[#allocation21_spill] sm:$0xff] }
 0x1a4   : > { %1464 = vmatprep.mubr.msk.bf16.mxu1 %vm303_vm0, %v748_v7  ;;  %1488 = vmatprep.mubr.msk.bf16.mxu0 %vm303_vm0, %v967_v51  ;;  %v744_v60 = vmul.f32 %v736_v35, %v720_v34  ;;  %v963_v61 = vmul.f32 %v955_v58, %v939_v27  ;;  %v1075_v25 = vsub.f32 %v2633_v0, %v2436_v38 }
 0x1a5   : > { %v702_v14 = vmul.f32 %v694_v29, %v679_v47  ;;  %v1100_v11 = vmul.f32 %v1092_v40, %v1076_v16  ;;  %v696_v22 = vmul.f32 %v1649_v28, %v2343_v62  ;;  %v1093_v20 = vmul.f32 %v1649_v28, %v2345_v63 }
 0x1a6   : > { %v749_v18 = vpack.c.bf16 %v745_v21, %v744_v60  ;;  %v968_v19 = vpack.c.bf16 %v964_v59, %v963_v61  ;;  %v1099_v30 = vmul.f32 %v1091_v48, %v1075_v25  ;;  %v681_v38 = vsub.f32 %v2635_v1, %v2440_v43 }
 0x1a7   : > { %v1078_v41 = vsub.f32 %v2638_v39, %v2438_v44  ;;  %v1101_v52 = vmul.f32 %v1093_v20, %v1077_v8 }
 0x1a8   : > { %1465 = vmatmul.mubr.msk.bf16.gmra.mrb[4].mxu1 %vm303_vm0, %v749_v18  ;;  %1489 = vmatmul.mubr.msk.bf16.gmra.mrb[4].mxu0 %vm303_vm0, %v968_v19  ;;  %v1105_v31 = vpack.c.bf16 %v1100_v11, %v1099_v30  ;;  %v704_v42 = vmul.f32 %v696_v22, %v681_v38 }
 0x1a9   : > { %1472 = vmatprep.mubr.msk.bf16.mxu1 %vm303_vm0, %v706_v3  ;;  %1496 = vmatprep.mubr.msk.bf16.mxu0 %vm303_vm0, %v1103_v2  ;;  %v697_v3 = vmul.f32 %v1647_v10, %v2343_v62  ;;  %v708_v2 = vpack.c.bf16 %v703_v15, %v702_v14  ;;  %v2636_v62 = vld [vmem:[#allocation13_spill] sm:$0xff]  ;;  %v1102_v26 = vmul.f32 %v1094_v23, %v1078_v41 }
 0x1aa   : > { %v682_v63 = vsub.f32 %v2636_v62, %v2438_v44 }
 0x1ac   : > { %v705_v37 = vmul.f32 %v697_v3, %v682_v63 }
 0x1b0   : > { %1473 = vmatmul.mubr.msk.bf16.vlgmr.msra.gmra.mrb[0].mxu1 %vm303_vm0, %v707_v53  ;;  %1497 = vmatmul.mubr.msk.bf16.vlgmr.msra.gmra.mrb[0].mxu0 %vm303_vm0, %v1104_v36  ;;  %v709_v53 = vpack.c.bf16 %v705_v37, %v704_v42  ;;  %v1106_v36 = vpack.c.bf16 %v1102_v26, %v1101_v52 }
 0x1b1   : > { %1476 = vmatprep.mubr.msk.bf16.mxu1 %vm303_vm0, %v708_v2  ;;  %1500 = vmatprep.mubr.msk.bf16.mxu0 %vm303_vm0, %v1105_v31 }
 0x1b8   : > { %1477 = vmatmul.mubr.msk.bf16.gmra.mrb[4].mxu1 %vm303_vm0, %v709_v53  ;;  %1501 = vmatmul.mubr.msk.bf16.gmra.mrb[4].mxu0 %vm303_vm0, %v1106_v36 }
 0x283   : > { %v1474_v44 = vpop.f32.mrb[0].mxu1  ;;  %v1498_v43 = vpop.f32.mrb[0].mxu0 }
 0x284   : > { %v1504_v9 = vadd.f32 %v1498_v43, %v1474_v44  ;;  %v902_v10 = vpop.f32.mrb[1].mxu1  ;;  %v1170_v24 = vpop.f32.mrb[1].mxu0 }
 0x285   : > { %v1505_v17 = vadd.f32 %v1170_v24, %v902_v10  ;;  %v1475_v56 = vpop.f32.mrb[2].mxu1  ;;  %v1499_v34 = vpop.f32.mrb[2].mxu0 }
 0x286   : > { %v1218_v45 = vadd.f32 %v1504_v9, %v1428_v46  ;;  %v1506_v13 = vadd.f32 %v1499_v34, %v1475_v56  ;;  %v905_v28 = vpop.f32.mrb[3].mxu1  ;;  %v1173_v33 = vpop.f32.mrb[3].mxu0 }
 0x287   : > { %v1216_v12 = vadd.f32 %v1505_v17, %v1428_v46  ;;  %v1507_v27 = vadd.f32 %v1173_v33, %v905_v28 }
 0x288   : > { %1227 = vst.msk [vmem:[%s2531_s18 + $0x10] sm:$0xff] %vm1224_vm1, %v1218_v45  ;;  %v1219_v57 = vadd.f32 %v1506_v13, %v1428_v46 }
 0x289   : > { %1225 = vst.msk [vmem:[%s2531_s18] sm:$0xff] %vm1224_vm1, %v1216_v12  ;;  %v1217_v6 = vadd.f32 %v1507_v27, %v1428_v46 }
 0x28a   : > { %1228 = vst.msk [vmem:[%s2531_s18 + $0x18] sm:$0xff] %vm1224_vm1, %v1219_v57 }
 0x28b   : > { %1226 = vst.msk [vmem:[%s2531_s18 + $0x8] sm:$0xff] %vm1224_vm1, %v1217_v6  ;;  %v1478_v50 = vpop.f32.mrb[4].mxu1  ;;  %v1502_v7 = vpop.f32.mrb[4].mxu0 }
 0x28c   : > { %v1508_v51 = vadd.f32 %v1502_v7, %v1478_v50  ;;  %v918_v35 = vpop.f32.mrb[5].mxu1  ;;  %v1186_v58 = vpop.f32.mrb[5].mxu0 }
 0x28d   : > { %v1509_v21 = vadd.f32 %v1186_v58, %v918_v35  ;;  %v1479_v59 = vpop.f32.mrb[6].mxu1  ;;  %v1503_v60 = vpop.f32.mrb[6].mxu0 }
 0x28e   : > { %v1222_v61 = vadd.f32 %v1508_v51, %v1428_v46  ;;  %v1510_v18 = vadd.f32 %v1503_v60, %v1479_v59  ;;  %v921_v19 = vpop.f32.mrb[7].mxu1  ;;  %v1189_v29 = vpop.f32.mrb[7].mxu0 }
 0x28f   : > { %v1220_v32 = vadd.f32 %v1509_v21, %v1428_v46  ;;  %v1511_v48 = vadd.f32 %v1189_v29, %v921_v19 }
 0x290   : > { %1231 = vst.msk [vmem:[%s2531_s18 + $0x30] sm:$0xff] %vm1224_vm1, %v1222_v61  ;;  %v1223_v40 = vadd.f32 %v1510_v18, %v1428_v46 }
 0x291   : > { %1229 = vst.msk [vmem:[%s2531_s18 + $0x20] sm:$0xff] %vm1224_vm1, %v1220_v32  ;;  %v1221_v55 = vadd.f32 %v1511_v48, %v1428_v46 }
 0x292   : > { %1232 = vst.msk [vmem:[%s2531_s18 + $0x38] sm:$0xff] %vm1224_vm1, %v1223_v40 }
 0x293   : > { %1230 = vst.msk [vmem:[%s2531_s18 + $0x28] sm:$0xff] %vm1224_vm1, %v1221_v55 }
 0x294 PF: > { %s18_s22 = sadd.s32 1, %s1806_s22   ;;  %s2639_s19 = smov %s1979_s15 }
 0x295   : > { %p15_p1 = scmp.ge.s32.totalorder %s18_s22, 6   ;;  %s2640_s9 = sld [smem:[#allocation9_spill]] }
 0x296   : > { %s2641_s15 = smov %s1782_s16  ;;  %s2642_s16 = smov %s1786_s17 }
 0x297   : > { %s2643_s17 = smov %s2639_s19  ;;  %s2644_s18 = smov %s1798_s20 }
 0x298   : > { %s2645_s19 = smov %s1802_s21  ;;  %s2647_s21 = smov %s2653_s27 }
 0x299   :  { %17 = sbr.rel (!%p15_p1) target bundleno = 9 (0x9), region = 93 }
 0x29b   : > { %s2646_s20 = smov %s2640_s9 }
 0x2a0   :  { %1266 = vsyncpa [#allocation3], 1 }
 0x2a1   :  { %1268 = vsyncpa [#allocation3 + $0x1], 1 }
 0x2a2   :  { %1269 = vsyncpa [#allocation5], 1 }

</bundles_post_ra>
